<compile_context>
chip_gen: v6e
topology: v6e:2x2x1
jax: 0.10.0
libtpu: 0.0.40
codegen_flags: <defaults>
</compile_context>

<pallas_src>
import functools

import jax
import jax.numpy as jnp
from jax.experimental import pallas as pl
from jax.experimental.pallas import tpu as pltpu


_LANE = 128        # TPU lane width (last-dim tile)
_NEG_INF = -1e30   # finite "minus infinity" baked into padded bias columns


def _round_up(v, m):
    return (v + m - 1) // m * m


def _pad2(a, rows, cols):
    r, c = a.shape
    return jnp.pad(a, ((0, rows - r), (0, cols - c)))


def _pick_row_tile(n_p, max_stream_bytes=16 * 1024 * 1024):
    """Largest row tile that divides Np and keeps the double-buffered
    (tm, Np) bf16 adjacency stream under a modest VMEM budget."""
    for tm in (512, 256, 128):
        if n_p % tm == 0 and 2 * tm * n_p * 2 <= max_stream_bytes:
            return tm
    return 128


def _gcn_kernel(adj_ref, x_ref, *rest, num_layers, tm, layer_fout_ps):
    """Row-tiled fused GCN forward.  Grid = (layer, row_tile).

    Refs (all padded to lane multiples):
      adj_ref  [tm, Np]        bf16  streamed row block of Â
      x_ref    [Np, Fp]        bf16  resident node features
      per layer: w_l [Fin_p, Fout_p] bf16, b_l [1, Fout_p] f32   (resident)
      out_ref  [tm, Cp]        f32
      z_scr    [Np, maxFout_p] bf16  cached per-layer transform h_{l-1} @ W_l
      h_scr    [Np, Hp]        bf16  hidden activations (persist across grid)
    """
    wb = rest[: 2 * num_layers]
    out_ref = rest[2 * num_layers]
    z_scr = rest[2 * num_layers + 1]
    h_scr = rest[2 * num_layers + 2]

    l = pl.program_id(0)
    i = pl.program_id(1)
    row0 = pl.multiple_of(i * tm, tm)

    for layer in range(num_layers):

        @pl.when(l == layer)
        def _(layer=layer, fout_p=layer_fout_ps[layer]):
            w_ref = wb[2 * layer]
            b_ref = wb[2 * layer + 1]

            # Per-layer feature transform z = h_{l-1} @ W_l: computed once per
            # layer (first row tile), cached in VMEM for all row tiles.
            @pl.when(i == 0)
            def _():
                h_in = x_ref[...] if layer == 0 else h_scr[...]
                z = jnp.dot(h_in, w_ref[...],
                            preferred_element_type=jnp.float32)
                z_scr[:, :fout_p] = z.astype(jnp.bfloat16)

            # Neighborhood aggregation for this row tile: bf16 MXU matmul with
            # f32 accumulation, overlapped with the next adjacency block's DMA.
            hz = jnp.dot(adj_ref[...], z_scr[:, :fout_p],
                         preferred_element_type=jnp.float32)
            hz = hz + b_ref[...]

            if layer < num_layers - 1:
                # ReLU (inference dropout is the identity); hidden activations
                # never leave VMEM.
                h_scr[pl.ds(row0, tm), :] = jnp.maximum(hz, 0.0).astype(jnp.bfloat16)
                # Placeholder write; overwritten by the last layer's pass.
                out_ref[...] = jnp.zeros_like(out_ref)
            else:
                # log_softmax over classes.  Padded class columns already carry
                # a -1e30 bias (baked in by the wrapper), so no in-kernel mask.
                m = jnp.max(hz, axis=1, keepdims=True)
                s = hz - m
                lse = jnp.log(jnp.sum(jnp.exp(s), axis=1, keepdims=True))
                out_ref[...] = (s - lse).astype(out_ref.dtype)


def precompute_normalized_adjacency(edge_index, num_nodes, pad_to=None):
    """Dense Â = D^-1/2 (A + I) D^-1/2 (messages flow src -> dst), zero-padded
    to `pad_to` lanes and cast to bf16.  Graph-static: compute once, cache."""
    if pad_to is None:
        pad_to = _round_up(num_nodes, _LANE)
    src = edge_index[0]
    dst = edge_index[1]
    a = jnp.zeros((num_nodes, num_nodes), jnp.float32)
    a = a.at[dst, src].add(1.0)                 # A[i, j] for edge j -> i
    idx = jnp.arange(num_nodes)
    a = a.at[idx, idx].add(1.0)                 # self loops (no dense eye)
    deg = jnp.sum(a, axis=1)
    dinv = jnp.where(deg > 0.0, jax.lax.rsqrt(deg), 0.0)
    a = dinv[:, None] * a * dinv[None, :]
    return _pad2(a, pad_to, pad_to).astype(jnp.bfloat16)


def gcn_forward(x, edge_index, params, adj_p=None):
    """Full GCN forward.  x [N,F] f32, edge_index [2,E] int32, params [(w,b)].
    Pass a cached `adj_p` (from precompute_normalized_adjacency) to avoid
    rebuilding the graph-static adjacency every call."""
    n, f = x.shape
    num_layers = len(params)
    num_classes = params[-1][0].shape[1]

    n_p = _round_up(n, _LANE)
    f_p = _round_up(f, _LANE)

    if adj_p is None:
        adj_p = precompute_normalized_adjacency(edge_index, n, n_p)
    else:
        assert adj_p.shape == (n_p, n_p), (adj_p.shape, n_p)

    x_p = _pad2(x.astype(jnp.float32), n_p, f_p).astype(jnp.bfloat16)

    # Pad weights/biases to 128-lane widths.  Padded weight rows/cols are zero;
    # the LAST layer's padded bias columns are -1e30 so padded class columns
    # vanish from the log-softmax normalizer with no in-kernel masking.
    flat = []
    layer_fout_ps = []
    f_in_p = f_p
    for li, (w, b) in enumerate(params):
        _, f_out = w.shape
        f_out_p = _round_up(f_out, _LANE)
        w_p = _pad2(w.astype(jnp.float32), f_in_p, f_out_p).astype(jnp.bfloat16)
        pad_val = _NEG_INF if li == num_layers - 1 else 0.0
        b_p = jnp.pad(b.astype(jnp.float32), (0, f_out_p - f_out),
                      constant_values=pad_val).reshape(1, f_out_p)
        flat += [w_p, b_p]
        layer_fout_ps.append(f_out_p)
        f_in_p = f_out_p
    classes_p = layer_fout_ps[-1]
    hidden_p = layer_fout_ps[0]
    max_fout_p = max(layer_fout_ps)

    tm = _pick_row_tile(n_p)
    num_tiles = n_p // tm
    grid = (num_layers, num_tiles)

    # Explicit VMEM budget (assume double buffering of every operand) so the
    # default 16/32 MiB scoped limit never bites; capped at v7x's 64 MiB.
    est = 2 * tm * n_p * 2                              # streamed Â blocks
    est += 2 * n_p * f_p * 2                            # resident features
    for wp, bp in zip(flat[0::2], flat[1::2]):
        est += 2 * (wp.size * 2 + bp.size * 4)          # weights + biases
    est += 2 * tm * classes_p * 4                       # output blocks
    est += n_p * max_fout_p * 2 + n_p * hidden_p * 2    # z / hidden scratch
    vmem_limit = int(min(64 * 1024 * 1024, max(16 * 1024 * 1024, 2 * est)))

    kernel = functools.partial(
        _gcn_kernel, num_layers=num_layers, tm=tm,
        layer_fout_ps=tuple(layer_fout_ps))

    in_specs = [
        # Â: streamed one (tm, Np) row block per grid step (re-streamed once
        # per layer); Pallas double-buffers it -> DMA overlaps MXU compute.
        pl.BlockSpec((tm, n_p), lambda l, i: (i, 0)),
        # Node features: resident (constant block index => fetched once).
        pl.BlockSpec((n_p, f_p), lambda l, i: (0, 0)),
    ]
    for wp, bp in zip(flat[0::2], flat[1::2]):
        in_specs.append(pl.BlockSpec(wp.shape, lambda l, i: (0, 0)))
        in_specs.append(pl.BlockSpec(bp.shape, lambda l, i: (0, 0)))

    out_p = pl.pallas_call(
        kernel,
        out_shape=jax.ShapeDtypeStruct((n_p, classes_p), jnp.float32),
        grid=grid,
        in_specs=in_specs,
        out_specs=pl.BlockSpec((tm, classes_p), lambda l, i: (i, 0)),
        scratch_shapes=[
            pltpu.VMEM((n_p, max_fout_p), jnp.bfloat16),   # z = h @ W cache
            pltpu.VMEM((n_p, hidden_p), jnp.bfloat16),     # hidden activations
        ],
        compiler_params=pltpu.CompilerParams(
            # Layer axis is a hard dependency chain; row axis stays
            # "arbitrary" because hidden activations live in per-core VMEM.
            dimension_semantics=("arbitrary", "arbitrary"),
            vmem_limit_bytes=vmem_limit,
        ),
    )(adj_p, x_p, *flat)
    return out_p[:n, :num_classes]


def gcn_reference(x, edge_index, params):
    """Pure-JAX f32 reference of the same forward pass."""
    src = edge_index[0]
    dst = edge_index[1]
    n = x.shape[0]
    a = jnp.zeros((n, n), jnp.float32)
    a = a.at[dst, src].add(1.0)
    idx = jnp.arange(n)
    a = a.at[idx, idx].add(1.0)
    deg = jnp.sum(a, axis=1)
    dinv = jnp.where(deg > 0.0, jax.lax.rsqrt(deg), 0.0)
    adj = dinv[:, None] * a * dinv[None, :]

    h = x.astype(jnp.float32)
    num_layers = len(params)
    for i, (w, b) in enumerate(params):
        h = adj @ (h @ w) + b[None, :]
        if i < num_layers - 1:
            h = jnp.maximum(h, 0.0)
        else:
            h = jax.nn.log_softmax(h, axis=1)
    return h


def init_params(key, num_features, hidden_channels, num_classes, num_layers):
    """Deterministic glorot-style uniform init for each GCNConv layer."""
    dims = [num_features] + [hidden_channels] * (num_layers - 1) + [num_classes]
    params = []
    for i in range(num_layers):
        f_in, f_out = dims[i], dims[i + 1]
        key, kw, kb = jax.random.split(key, 3)
        stdv = 1.0 / jnp.sqrt(jnp.float32(f_in))
        w = jax.random.uniform(kw, (f_in, f_out), jnp.float32, -stdv, stdv)
        b = jax.random.uniform(kb, (f_out,), jnp.float32, -stdv, stdv)
        params.append((w, b))
    return params


if __name__ == "__main__":
    # Small synthetic graph consistent with the module's forward.  N=200 pads
    # to Np=256, so the row-tiled grid (tm=128) actually exercises streaming.
    NUM_NODES = 200
    NUM_FEATURES = 96
    HIDDEN = 32
    NUM_CLASSES = 7
    NUM_LAYERS = 2
    NUM_EDGES = 600

    key = jax.random.PRNGKey(0)
    kx, ke1, ke2, kp = jax.random.split(key, 4)

    x = jax.random.normal(kx, (NUM_NODES, NUM_FEATURES), jnp.float32)
    src = jax.random.randint(ke1, (NUM_EDGES,), 0, NUM_NODES, jnp.int32)
    dst = jax.random.randint(ke2, (NUM_EDGES,), 0, NUM_NODES, jnp.int32)
    edge_index = jnp.stack([src, dst], axis=0)   # [2, E]

    params = init_params(kp, NUM_FEATURES, HIDDEN, NUM_CLASSES, NUM_LAYERS)

    # Â is graph-static: build + pad + bf16-cast it ONCE and reuse across calls.
    adj_p = precompute_normalized_adjacency(edge_index, NUM_NODES)

    out = gcn_forward(x, edge_index, params, adj_p=adj_p)
    out = jax.block_until_ready(out)

    assert out.shape == (NUM_NODES, NUM_CLASSES)
    # log_softmax rows should sum to 1 in probability space (padded class
    # columns carry a -inf bias, so they never enter the normalizer).
    assert jnp.allclose(jnp.sum(jnp.exp(out), axis=1), 1.0, atol=1e-4)
    # Pure-JAX f32 reference; loose tolerance because the kernel uses bf16
    # MXU inputs with f32 accumulation.
    ref = gcn_reference(x, edge_index, params)
    max_err = float(jnp.max(jnp.abs(out - ref)))
    assert max_err < 5e-2, max_err
    print("KERNEL_OK")
</pallas_src>

<mosaic_0001>
module attributes {stable_mosaic.version = 11 : i64} {
  func.func @_gcn_kernel(%arg0: i32, %arg1: i32, %arg2: memref<256x256xbf16, #tpu.memory_space<vmem>>, %arg3: memref<256x128xbf16, #tpu.memory_space<vmem>>, %arg4: memref<128x128xbf16, #tpu.memory_space<vmem>>, %arg5: memref<1x128xf32, #tpu.memory_space<vmem>>, %arg6: memref<128x128xbf16, #tpu.memory_space<vmem>>, %arg7: memref<1x128xf32, #tpu.memory_space<vmem>>, %arg8: memref<256x128xf32, #tpu.memory_space<vmem>>, %arg9: memref<256x128xbf16, #tpu.memory_space<vmem>>, %arg10: memref<256x128xbf16, #tpu.memory_space<vmem>>) attributes {dimension_semantics = [#tpu.dimension_semantics<arbitrary>, #tpu.dimension_semantics<arbitrary>], iteration_bounds = array<i64: 2, 1>, scalar_prefetch = 0 : i64, scratch_operands = 2 : i64, tpu.core_type = #tpu.core_type<tc>, window_params = [{transform_indices = @transform_0, window_bounds = array<i64: 256, 256>}, {pipeline_mode = #tpu.pipeline_mode<synchronous>, transform_indices = @transform_1, window_bounds = array<i64: 256, 128>}, {pipeline_mode = #tpu.pipeline_mode<synchronous>, transform_indices = @transform_2, window_bounds = array<i64: 128, 128>}, {pipeline_mode = #tpu.pipeline_mode<synchronous>, transform_indices = @transform_3, window_bounds = array<i64: 1, 128>}, {pipeline_mode = #tpu.pipeline_mode<synchronous>, transform_indices = @transform_4, window_bounds = array<i64: 128, 128>}, {pipeline_mode = #tpu.pipeline_mode<synchronous>, transform_indices = @transform_5, window_bounds = array<i64: 1, 128>}, {transform_indices = @transform_6, window_bounds = array<i64: 256, 128>}]} {
    %c256_i32 = arith.constant 256 : i32
    %0 = arith.muli %arg1, %c256_i32 : i32
    %1 = tpu.assume_multiple %0, 256 : i32
    %c0_i32 = arith.constant 0 : i32
    %2 = arith.cmpi eq, %arg0, %c0_i32 : i32
    %3 = arith.extui %2 : i1 to i32
    %c0_i32_0 = arith.constant 0 : i32
    %4 = arith.cmpi ne, %3, %c0_i32_0 : i32
    scf.if %4 {
      %c0_i32_2 = arith.constant 0 : i32
      %8 = arith.cmpi eq, %arg1, %c0_i32_2 : i32
      %9 = arith.extui %8 : i1 to i32
      %c0_i32_3 = arith.constant 0 : i32
      %10 = arith.cmpi ne, %9, %c0_i32_3 : i32
      scf.if %10 {
        %c0_14 = arith.constant 0 : index
        %c0_15 = arith.constant 0 : index
        %24 = vector.load %arg3[%c0_14, %c0_15] : memref<256x128xbf16, #tpu.memory_space<vmem>>, vector<256x128xbf16>
        %c0_16 = arith.constant 0 : index
        %c0_17 = arith.constant 0 : index
        %25 = vector.load %arg4[%c0_16, %c0_17] : memref<128x128xbf16, #tpu.memory_space<vmem>>, vector<128x128xbf16>
        %cst_18 = arith.constant dense<0.000000e+00> : vector<256x128xf32>
        %26 = tpu.matmul %24, %25, %cst_18 {dimension_numbers = #tpu.dot_dimension_numbers<[1], [0], [0], [1], [0, 0, 1, 1], [], []>} : vector<256x128xbf16>, vector<128x128xbf16>, vector<256x128xf32> -> vector<256x128xf32>
        %27 = arith.truncf %26 : vector<256x128xf32> to vector<256x128xbf16>
        %c0_19 = arith.constant 0 : index
        %c0_20 = arith.constant 0 : index
        %28 = vector.load %arg9[%c0_19, %c0_20] : memref<256x128xbf16, #tpu.memory_space<vmem>>, vector<256x128xbf16>
        tpu.vector_store %arg9[%c0_19, %c0_20], %27 {strides = array<i32>} : memref<256x128xbf16, #tpu.memory_space<vmem>>, vector<256x128xbf16>,
      } else {
      }
      %c0 = arith.constant 0 : index
      %c0_4 = arith.constant 0 : index
      %11 = vector.load %arg2[%c0, %c0_4] : memref<256x256xbf16, #tpu.memory_space<vmem>>, vector<256x256xbf16>
      %c0_5 = arith.constant 0 : index
      %c0_6 = arith.constant 0 : index
      %12 = vector.load %arg9[%c0_5, %c0_6] : memref<256x128xbf16, #tpu.memory_space<vmem>>, vector<256x128xbf16>
      %cst = arith.constant dense<0.000000e+00> : vector<256x128xf32>
      %13 = tpu.matmul %11, %12, %cst {dimension_numbers = #tpu.dot_dimension_numbers<[1], [0], [0], [1], [0, 0, 1, 1], [], []>} : vector<256x256xbf16>, vector<256x128xbf16>, vector<256x128xf32> -> vector<256x128xf32>
      %c0_7 = arith.constant 0 : index
      %c0_8 = arith.constant 0 : index
      %14 = vector.load %arg5[%c0_7, %c0_8] : memref<1x128xf32, #tpu.memory_space<vmem>>, vector<1x128xf32>
      %15 = vector.broadcast %14 : vector<1x128xf32> to vector<256x128xf32>
      %16 = arith.addf %13, %15 : vector<256x128xf32>
      %cst_9 = arith.constant 0.000000e+00 : f32
      %17 = vector.broadcast %cst_9 : f32 to vector<256x128xf32>
      %18 = arith.maximumf %16, %17 : vector<256x128xf32>
      %19 = arith.truncf %18 : vector<256x128xf32> to vector<256x128xbf16>
      %20 = arith.index_cast %1 : i32 to index
      %c0_10 = arith.constant 0 : index
      %21 = vector.load %arg10[%20, %c0_10] : memref<256x128xbf16, #tpu.memory_space<vmem>>, vector<256x128xbf16>
      tpu.vector_store %arg10[%20, %c0_10], %19 {strides = array<i32>} : memref<256x128xbf16, #tpu.memory_space<vmem>>, vector<256x128xbf16>,
      %cst_11 = arith.constant 0.000000e+00 : f32
      %22 = vector.broadcast %cst_11 : f32 to vector<256x128xf32>
      %c0_12 = arith.constant 0 : index
      %c0_13 = arith.constant 0 : index
      %23 = vector.load %arg8[%c0_12, %c0_13] : memref<256x128xf32, #tpu.memory_space<vmem>>, vector<256x128xf32>
      tpu.vector_store %arg8[%c0_12, %c0_13], %22 {strides = array<i32>} : memref<256x128xf32, #tpu.memory_space<vmem>>, vector<256x128xf32>,
    } else {
    }
    %c1_i32 = arith.constant 1 : i32
    %5 = arith.cmpi eq, %arg0, %c1_i32 : i32
    %6 = arith.extui %5 : i1 to i32
    %c0_i32_1 = arith.constant 0 : i32
    %7 = arith.cmpi ne, %6, %c0_i32_1 : i32
    scf.if %7 {
      %c0_i32_2 = arith.constant 0 : i32
      %8 = arith.cmpi eq, %arg1, %c0_i32_2 : i32
      %9 = arith.extui %8 : i1 to i32
      %c0_i32_3 = arith.constant 0 : i32
      %10 = arith.cmpi ne, %9, %c0_i32_3 : i32
      scf.if %10 {
        %c0_13 = arith.constant 0 : index
        %c0_14 = arith.constant 0 : index
        %28 = vector.load %arg10[%c0_13, %c0_14] : memref<256x128xbf16, #tpu.memory_space<vmem>>, vector<256x128xbf16>
        %c0_15 = arith.constant 0 : index
        %c0_16 = arith.constant 0 : index
        %29 = vector.load %arg6[%c0_15, %c0_16] : memref<128x128xbf16, #tpu.memory_space<vmem>>, vector<128x128xbf16>
        %cst_17 = arith.constant dense<0.000000e+00> : vector<256x128xf32>
        %30 = tpu.matmul %28, %29, %cst_17 {dimension_numbers = #tpu.dot_dimension_numbers<[1], [0], [0], [1], [0, 0, 1, 1], [], []>} : vector<256x128xbf16>, vector<128x128xbf16>, vector<256x128xf32> -> vector<256x128xf32>
        %31 = arith.truncf %30 : vector<256x128xf32> to vector<256x128xbf16>
        %c0_18 = arith.constant 0 : index
        %c0_19 = arith.constant 0 : index
        %32 = vector.load %arg9[%c0_18, %c0_19] : memref<256x128xbf16, #tpu.memory_space<vmem>>, vector<256x128xbf16>
        tpu.vector_store %arg9[%c0_18, %c0_19], %31 {strides = array<i32>} : memref<256x128xbf16, #tpu.memory_space<vmem>>, vector<256x128xbf16>,
      } else {
      }
      %c0 = arith.constant 0 : index
      %c0_4 = arith.constant 0 : index
      %11 = vector.load %arg2[%c0, %c0_4] : memref<256x256xbf16, #tpu.memory_space<vmem>>, vector<256x256xbf16>
      %c0_5 = arith.constant 0 : index
      %c0_6 = arith.constant 0 : index
      %12 = vector.load %arg9[%c0_5, %c0_6] : memref<256x128xbf16, #tpu.memory_space<vmem>>, vector<256x128xbf16>
      %cst = arith.constant dense<0.000000e+00> : vector<256x128xf32>
      %13 = tpu.matmul %11, %12, %cst {dimension_numbers = #tpu.dot_dimension_numbers<[1], [0], [0], [1], [0, 0, 1, 1], [], []>} : vector<256x256xbf16>, vector<256x128xbf16>, vector<256x128xf32> -> vector<256x128xf32>
      %c0_7 = arith.constant 0 : index
      %c0_8 = arith.constant 0 : index
      %14 = vector.load %arg7[%c0_7, %c0_8] : memref<1x128xf32, #tpu.memory_space<vmem>>, vector<1x128xf32>
      %15 = vector.broadcast %14 : vector<1x128xf32> to vector<256x128xf32>
      %16 = arith.addf %13, %15 : vector<256x128xf32>
      %cst_9 = arith.constant dense<0xFF800000> : vector<256xf32>
      %17 = vector.multi_reduction <maximumf>, %16, %cst_9 [1] : vector<256x128xf32> to vector<256xf32>
      %18 = vector.shape_cast %17 : vector<256xf32> to vector<256x1xf32>
      %19 = vector.broadcast %18 : vector<256x1xf32> to vector<256x128xf32>
      %20 = arith.subf %16, %19 : vector<256x128xf32>
      %21 = math.exp %20 : vector<256x128xf32>
      %cst_10 = arith.constant dense<0.000000e+00> : vector<256xf32>
      %22 = vector.multi_reduction <add>, %21, %cst_10 [1] : vector<256x128xf32> to vector<256xf32>
      %23 = vector.shape_cast %22 : vector<256xf32> to vector<256x1xf32>
      %24 = math.log %23 : vector<256x1xf32>
      %25 = vector.broadcast %24 : vector<256x1xf32> to vector<256x128xf32>
      %26 = arith.subf %20, %25 : vector<256x128xf32>
      %c0_11 = arith.constant 0 : index
      %c0_12 = arith.constant 0 : index
      %27 = vector.load %arg8[%c0_11, %c0_12] : memref<256x128xf32, #tpu.memory_space<vmem>>, vector<256x128xf32>
      tpu.vector_store %arg8[%c0_11, %c0_12], %26 {strides = array<i32>} : memref<256x128xf32, #tpu.memory_space<vmem>>, vector<256x128xf32>,
    } else {
    }
    return
  }
  func.func @transform_0(%arg0: i32, %arg1: i32) -> (i32, i32) {
    %c0_i32 = arith.constant 0 : i32
    %c0_i32_0 = arith.constant 0 : i32
    return %arg1, %c0_i32 : i32, i32
  }
  func.func @transform_1(%arg0: i32, %arg1: i32) -> (i32, i32) {
    %c0_i32 = arith.constant 0 : i32
    %c0_i32_0 = arith.constant 0 : i32
    %c0_i32_1 = arith.constant 0 : i32
    return %c0_i32, %c0_i32_0 : i32, i32
  }
  func.func @transform_2(%arg0: i32, %arg1: i32) -> (i32, i32) {
    %c0_i32 = arith.constant 0 : i32
    %c0_i32_0 = arith.constant 0 : i32
    %c0_i32_1 = arith.constant 0 : i32
    return %c0_i32, %c0_i32_0 : i32, i32
  }
  func.func @transform_3(%arg0: i32, %arg1: i32) -> (i32, i32) {
    %c0_i32 = arith.constant 0 : i32
    %c0_i32_0 = arith.constant 0 : i32
    %c0_i32_1 = arith.constant 0 : i32
    return %c0_i32, %c0_i32_0 : i32, i32
  }
  func.func @transform_4(%arg0: i32, %arg1: i32) -> (i32, i32) {
    %c0_i32 = arith.constant 0 : i32
    %c0_i32_0 = arith.constant 0 : i32
    %c0_i32_1 = arith.constant 0 : i32
    return %c0_i32, %c0_i32_0 : i32, i32
  }
  func.func @transform_5(%arg0: i32, %arg1: i32) -> (i32, i32) {
    %c0_i32 = arith.constant 0 : i32
    %c0_i32_0 = arith.constant 0 : i32
    %c0_i32_1 = arith.constant 0 : i32
    return %c0_i32, %c0_i32_0 : i32, i32
  }
  func.func @transform_6(%arg0: i32, %arg1: i32) -> (i32, i32) {
    %c0_i32 = arith.constant 0 : i32
    %c0_i32_0 = arith.constant 0 : i32
    return %arg1, %c0_i32 : i32, i32
  }
}

</mosaic_0001>

<bundles_post_ra>
// kernel: tpu_custom_call.1
= control target key start
LH: loop header
LB: loop body
LE: loop exit
PB: predicated region body
PF: predicated region fallthrough
CT: control target
= control target key end

     0   :  { %11 = vsyncpa [#allocation5], 0  ;;  %s5098_s0 = inlined_call_operand.hbm [shape: bf16[256,256], index: 0, kind: input, shape index: {}]   ;;  %s5099_s1 = inlined_call_operand.hbm [shape: bf16[256,128], index: 1, kind: input, shape index: {}]   ;;  %s5100_s2 = inlined_call_operand.hbm [shape: bf16[128,128], index: 2, kind: input, shape index: {}]   ;;  %s5101_s3 = inlined_call_operand.vmem [shape: f32[1,128], index: 3, kind: input, shape index: {}]   ;;  %s5102_s4 = inlined_call_operand.hbm [shape: bf16[128,128], index: 4, kind: input, shape index: {}]   ;;  %s5103_s5 = inlined_call_operand.vmem [shape: f32[1,128], index: 5, kind: input, shape index: {}]   ;;  %s5104_s6 = inlined_call_operand.hbm [shape: f32[256,128], index: 6, kind: output, shape index: {}]  }
   0x1   :  { %12 = vsyncpa [#allocation8], 0 }
   0x2   :  { %13 = vsyncpa [#allocation11], 0 }
   0x3   :  { %14 = vsyncpa [#allocation6], 0  ;;  %s4638_s21 = smov 0   ;;  %s4640_s22 = smov 0  }
   0x4   :  { %s4642_s23 = smov 0  }
   0x5 LB: > { %s4591_s24 = smov [#allocation7]   ;;  %s3000_s26 = sadd.s32 4294967295, %s4589_s23   ;;  %s4589_s23 = sphi %s4642_s23, %s20_s23   ;;  %s4585_s22 = sphi %s4640_s22, %s5111_s22   ;;  %s4581_s21 = sphi %s4638_s21, %s5110_s21  }
   0x6   : > { %s223_s25 = sshll.u32 %s4591_s24, 4  ;;  %p3001_p0 = scmp.ge.s32.totalorder %s4589_s23, 1  ;;  %s224_s25 = int_to_ptr.vmem [resolvable:$true] %s223_s25 }
   0x7   : > { %p194_p1 = scmp.lt.s32.totalorder %s4589_s23, 3  ;;  %p4658_p2 = scmp.eq.s32.totalorder %s3000_s26, 0 }
   0x8   : > { %s32_s30 = sadd.s32 1, %s4585_s22  ;;  %s4592_s8 = smov [#allocation4]  }
   0x9   : > { %p4662_p3 = pnand %p3001_p0, %p194_p1  ;;  %p4675_p6 = scmp.ge.s32.totalorder %s32_s30, 2 }
   0xa   : > { %s210_s9 = sshll.u32 %s4592_s8, 4  ;;  %s4434_s10 = scalar_lea.vmem %s224_s25, 2048  ;;  %s211_s9 = int_to_ptr.vmem [resolvable:$true] %s210_s9 }
   0xb   : > { %p4060_p4 = pneg %p4662_p3  ;;  %p4435_p8 = scmp.ne.s32.totalorder %s224_s25, %s4434_s10 }
   0xc   : > { %p4442_p11 = scmp.lt.s32.totalorder %s224_s25, %s224_s25  ;;  %p4443_p12 = scmp.lt.s32.totalorder %s4434_s10, %s4434_s10 }
   0xd   : > { %p4670_p5 = pnand %p4658_p2, %p4060_p4 }
   0xe   : > { %p4444_p13 = por %p4443_p12, %p4442_p11 }
   0xf   : > { %p4425_p7 = pneg %p4670_p5 }
  0x11   : > { %p4437_p9 = pnand %p4435_p8, %p4425_p7 }
  0x13   : > { %p4438_p10 = pneg %p4437_p9 }
  0x15   : > { %p4445_p0 = pnand %p4444_p13, %p4438_p10 }
  0x17   : > { %4448 = shalt.err (!%p4445_p0)
}
  0x18   : > { %s4593_s11 = smov 64   ;;  %s4594_s12 = smov 4  }
  0x19   : > { %4066 = dma.hbm_to_vmem [thread:$0]  (!%p4670_p5), %s5099_s1, 2048, %s224_s25, [#allocation8], %s4593_s11, %s4593_s11, %s4594_s12  }
  0x1a   : > { %s5113_s30 = smov (%p4675_p6, %s32_s30), 0  ;;  %s4460_s15 = scalar_lea.vmem %s211_s9, 4096 }
  0x1b   : > { %p4461_p1 = scmp.ne.s32.totalorder %s211_s9, %s4460_s15  ;;  %p4468_p9 = scmp.lt.s32.totalorder %s211_s9, %s211_s9 }
  0x1c   : > { %p4469_p10 = scmp.lt.s32.totalorder %s4460_s15, %s4460_s15 }
  0x1d   : > { %p4463_p4 = pnand %p4461_p1, %p4425_p7 }
  0x1e   : > { %p4470_p11 = por %p4469_p10, %p4468_p9 }
  0x1f   : > { %p4464_p8 = pneg %p4463_p4 }
  0x21   : > { %p4471_p12 = pnand %p4470_p11, %p4464_p8 }
  0x23   : > { %4474 = shalt.err (!%p4471_p12)
}
  0x24   : > { %s4595_s16 = smov 128   ;;  %s4596_s17 = smov 8  }
  0x25   : > { %4063 = dma.hbm_to_vmem [thread:$0]  (!%p4670_p5), %s5098_s0, 4096, %s211_s9, [#allocation5], %s4595_s16, %s4595_s16, %s4596_s17  }
  0x26   : > { %s4597_s20 = smov [#allocation9]   ;;  %s4598_s25 = smov [#allocation10]  }
  0x27   : > { %s236_s24 = sshll.u32 %s4597_s20, 4  ;;  %s252_s7 = sshll.u32 %s4598_s25, 4  ;;  %s237_s24 = int_to_ptr.vmem [resolvable:$true] %s236_s24  ;;  %s253_s7 = int_to_ptr.vmem [resolvable:$true] %s252_s7 }
  0x28   : > { %s4486_s8 = scalar_lea.vmem %s237_s24, 1024  ;;  %p4494_p1 = scmp.lt.s32.totalorder %s237_s24, %s237_s24 }
  0x29   : > { %p4487_p6 = scmp.ne.s32.totalorder %s237_s24, %s4486_s8  ;;  %p4495_p4 = scmp.lt.s32.totalorder %s4486_s8, %s4486_s8 }
  0x2b   : > { %p4489_p13 = pnand %p4487_p6, %p4425_p7  ;;  %p4496_p8 = por %p4495_p4, %p4494_p1 }
  0x2d   : > { %p4490_p0 = pneg %p4489_p13 }
  0x2f   : > { %p4497_p9 = pnand %p4496_p8, %p4490_p0 }
  0x31   : > { %4500 = shalt.err (!%p4497_p9)
}
  0x32   : > { %4069 = dma.hbm_to_vmem [thread:$0]  (!%p4670_p5), %s5100_s2, 1024, %s237_s24, [#allocation8], %s4593_s11, %s4593_s11, %s4594_s12  }
  0x33   : > { %s4512_s13 = scalar_lea.vmem %s253_s7, 1024  ;;  %p4520_p6 = scmp.lt.s32.totalorder %s253_s7, %s253_s7 }
  0x34   : > { %p4513_p10 = scmp.ne.s32.totalorder %s253_s7, %s4512_s13  ;;  %p4521_p13 = scmp.lt.s32.totalorder %s4512_s13, %s4512_s13 }
  0x36   : > { %p4515_p11 = pnand %p4513_p10, %p4425_p7  ;;  %p4522_p0 = por %p4521_p13, %p4520_p6 }
  0x38   : > { %p4516_p12 = pneg %p4515_p11 }
  0x3a   : > { %p4523_p1 = pnand %p4522_p0, %p4516_p12 }
  0x3c   : > { %4526 = shalt.err (!%p4523_p1)
}
  0x3d   : > { %4072 = dma.hbm_to_vmem [thread:$0]  (!%p4670_p5), %s5102_s4, 1024, %s253_s7, [#allocation11], %s4593_s11, %s4593_s11, %s4594_s12  }
  0x3e   : > { %271 = sbr.rel (%p4662_p3) target bundleno = 1658 (0x67a), region = 44 }
  0x43   : > { %4564 = dma.done.wait (%p4658_p2), [#allocation5], 4096  }
  0x44   : > { %4566 = vsyncadd (%p4658_p2), [#allocation5], 4294963200 }
  0x45   : > { %4568 = dma.done.wait (%p4658_p2), [#allocation8], 3072  }
  0x46   : > { %4570 = vsyncadd (%p4658_p2), [#allocation8], 4294964224 }
  0x47   : > { %4572 = dma.done.wait (%p4658_p2), [#allocation11], 1024  }
  0x48   : > { %4574 = vsyncadd (%p4658_p2), [#allocation11], 4294966272  ;;  %p3011_p3 = scmp.ne.s32.totalorder %s4581_s21, 0 }
  0x4a   : > { %310 = sbr.rel (%p3011_p3) target bundleno = 703 (0x2bf), region = 64 }
  0x4f   : > { %v4119_v0 = vld [vmem:[#allocation9 + $0x38] sm:$0xff]   ;;  %v4120_v1 = vld [vmem:[#allocation9 + $0x30] sm:$0xff]   ;;  %v4121_v2 = vld [vmem:[#allocation9 + $0x28] sm:$0xff]  }
  0x50   : > { %3912 = vmatprep.subr.bf16.mxu0 %v4119_v0  ;;  %v4122_v3 = vld [vmem:[#allocation9 + $0x20] sm:$0xff]   ;;  %v4123_v5 = vld [vmem:[#allocation9 + $0x18] sm:$0xff]   ;;  %v4124_v6 = vld [vmem:[#allocation9 + $0x10] sm:$0xff]  }
  0x51   : > { %3913 = vmatpush3.bf16.msra.mxu0 %v4119_v0  ;;  %v4127_v4 = vld [vmem:[#allocation7] sm:$0xff]   ;;  %v4125_v7 = vld [vmem:[#allocation9 + $0x8] sm:$0xff]   ;;  %v4129_v10 = vld [vmem:[#allocation7 + $0x10] sm:$0xff]  }
  0x52   : > { %3914 = vmatprep.subr.bf16.mxu0 %v4120_v1  ;;  %3928 = vmatprep.mubr.bf16.mxu0 %v4127_v4  ;;  %v4126_v8 = vld [vmem:[#allocation9] sm:$0xff]   ;;  %v4128_v9 = vld [vmem:[#allocation7 + $0x8] sm:$0xff]   ;;  %v4130_v11 = vld [vmem:[#allocation7 + $0x18] sm:$0xff]  }
  0x53   : > { %v4131_v12 = vld [vmem:[#allocation7 + $0x20] sm:$0xff]   ;;  %v4132_v13 = vld [vmem:[#allocation7 + $0x28] sm:$0xff]   ;;  %v4133_v14 = vld [vmem:[#allocation7 + $0x30] sm:$0xff]  }
  0x54   : > { %v4134_v15 = vld [vmem:[#allocation7 + $0x38] sm:$0xff]   ;;  %v4135_v16 = vld [vmem:[#allocation7 + $0x40] sm:$0xff]   ;;  %v4136_v17 = vld [vmem:[#allocation7 + $0x48] sm:$0xff]  }
  0x55   : > { %3915 = vmatpush3.bf16.msra.mxu0 %v4120_v1  ;;  %v4137_v18 = vld [vmem:[#allocation7 + $0x50] sm:$0xff]   ;;  %v4138_v19 = vld [vmem:[#allocation7 + $0x58] sm:$0xff]   ;;  %v4139_v20 = vld [vmem:[#allocation7 + $0x60] sm:$0xff]  }
  0x56   : > { %3916 = vmatprep.subr.bf16.mxu0 %v4121_v2  ;;  %v4140_v21 = vld [vmem:[#allocation7 + $0x68] sm:$0xff]   ;;  %v4141_v22 = vld [vmem:[#allocation7 + $0x70] sm:$0xff]   ;;  %v4142_v23 = vld [vmem:[#allocation7 + $0x78] sm:$0xff]  }
  0x57   : > { %v4161_v24 = vld [vmem:[#allocation4 + $0x44] ss:$8 sps:$4 sm:$0xff]  }
  0x58   : > { %1219 = vmatprep.mubr.bf16.mxu1 %v4161_v24  ;;  %v4185_v49 = vld [vmem:[#allocation4 + $0x4] ss:$8 sps:$4 sm:$0xff]  }
  0x59   : > { %3917 = vmatpush3.bf16.msra.mxu0 %v4121_v2 }
  0x5a   : > { %3918 = vmatprep.subr.bf16.mxu0 %v4122_v3 }
  0x5d   : > { %3919 = vmatpush3.bf16.msra.mxu0 %v4122_v3 }
  0x5e   : > { %3920 = vmatprep.subr.bf16.mxu0 %v4123_v5 }
  0x61   : > { %3921 = vmatpush3.bf16.msra.mxu0 %v4123_v5 }
  0x62   : > { %3922 = vmatprep.subr.bf16.mxu0 %v4124_v6 }
  0x65   : > { %3923 = vmatpush3.bf16.msra.mxu0 %v4124_v6 }
  0x66   : > { %3924 = vmatprep.subr.bf16.mxu0 %v4125_v7 }
  0x69   : > { %3925 = vmatpush3.bf16.msra.mxu0 %v4125_v7 }
  0x6a   : > { %3926 = vmatprep.subr.bf16.mxu0 %v4126_v8 }
  0x6d   : > { %3927 = vmatpush3.bf16.msra.mxu0 %v4126_v8 }
  0x70   : > { %3929 = vmatmul.mubr.bf16.vlgmr.msra.gmra.mxu0 %v4128_v9 }
  0x71   : > { %3932 = vmatprep.mubr.bf16.mxu0 %v4129_v10 }
  0x78   : > { %3933 = vmatmul.mubr.bf16.gmra.mxu0 %v4130_v11 }
  0x79   : > { %3936 = vmatprep.mubr.bf16.mxu0 %v4131_v12 }
  0x80   : > { %3937 = vmatmul.mubr.bf16.gmra.mxu0 %v4132_v13 }
  0x81   : > { %3940 = vmatprep.mubr.bf16.mxu0 %v4133_v14 }
  0x88   : > { %3941 = vmatmul.mubr.bf16.gmra.mxu0 %v4134_v15 }
  0x89   : > { %3944 = vmatprep.mubr.bf16.mxu0 %v4135_v16 }
  0x90   : > { %3945 = vmatmul.mubr.bf16.gmra.mxu0 %v4136_v17 }
  0x91   : > { %3948 = vmatprep.mubr.bf16.mxu0 %v4137_v18 }
  0x98   : > { %3949 = vmatmul.mubr.bf16.gmra.mxu0 %v4138_v19 }
  0x99   : > { %3952 = vmatprep.mubr.bf16.mxu0 %v4139_v20 }
  0xa0   : > { %3953 = vmatmul.mubr.bf16.gmra.mxu0 %v4140_v21 }
  0xa1   : > { %3956 = vmatprep.mubr.bf16.mxu0 %v4141_v22 }
  0xa8   : > { %3957 = vmatmul.mubr.bf16.gmra.mxu0 %v4142_v23 }
  0xa9   : > { %1187 = vmatprep.mubr.bf16.mxu0 %v4185_v49  ;;  %v4188_v49 = vld [vmem:[#allocation4 + $0xc0] ss:$8 sps:$4 sm:$0xff]  }
 0x130   : > { %v3930_v25 = vpop.f32.mrf.mxu0 }
 0x132   : > { %v541_v26 = vpop.f32.mrf.mxu0 }
 0x134   : > { %v3931_v27 = vpop.f32.mrf.mxu0 }
 0x135   : > { %v3363_v28 = vpack.c.bf16 %v3931_v27, %v3930_v25  ;;  %v4183_v27 = vld [vmem:[#allocation4] ss:$8 sps:$4 sm:$0xff]  }
 0x136   : > { %v544_v29 = vpop.f32.mrf.mxu0 }
 0x137   : > { %3595 = vst [vmem:[#allocation2 + $0x8] sm:$0xff] %v3363_v28   ;;  %v3358_v30 = vpack.c.bf16 %v544_v29, %v541_v26  ;;  %v4159_v26 = vld [vmem:[#allocation4 + $0x40] ss:$8 sps:$4 sm:$0xff]   ;;  %v4162_v28 = vld [vmem:[#allocation4 + $0x54] ss:$8 sps:$4 sm:$0xff]  }
 0x138   : > { %v3934_v31 = vpop.f32.mrf.mxu0  ;;  %v4189_v29 = vld [vmem:[#allocation4 + $0x14] ss:$8 sps:$4 sm:$0xff]  }
 0x139   : > { %3359 = vst [vmem:[#allocation2] sm:$0xff] %v3358_v30   ;;  %v4164_v30 = vld [vmem:[#allocation4 + $0x50] ss:$8 sps:$4 sm:$0xff]  }
 0x13a   : > { %v557_v32 = vpop.f32.mrf.mxu0 }
 0x13c   : > { %v3935_v33 = vpop.f32.mrf.mxu0 }
 0x13d   : > { %v3373_v34 = vpack.c.bf16 %v3935_v33, %v3934_v31  ;;  %v4191_v31 = vld [vmem:[#allocation4 + $0x10] ss:$8 sps:$4 sm:$0xff]   ;;  %v4195_v33 = vld [vmem:[#allocation4 + $0x24] ss:$8 sps:$4 sm:$0xff]  }
 0x13e   : > { %v560_v35 = vpop.f32.mrf.mxu0  ;;  %v4156_v23 = vld [vmem:[#allocation2 + $0x8] sm:$0xff]  }
 0x13f   : > { %3597 = vst [vmem:[#allocation2 + $0x18] sm:$0xff] %v3373_v34   ;;  %v3368_v36 = vpack.c.bf16 %v560_v35, %v557_v32  ;;  %v4165_v32 = vld [vmem:[#allocation4 + $0x64] ss:$8 sps:$4 sm:$0xff]   ;;  %v4167_v34 = vld [vmem:[#allocation4 + $0x60] ss:$8 sps:$4 sm:$0xff]  }
 0x140   : > { %v3938_v37 = vpop.f32.mrf.mxu0  ;;  %v4158_v25 = vld [vmem:[#allocation2] sm:$0xff]  }
 0x141   : > { %3596 = vst [vmem:[#allocation2 + $0x10] sm:$0xff] %v3368_v36   ;;  %v4197_v35 = vld [vmem:[#allocation4 + $0x20] ss:$8 sps:$4 sm:$0xff]   ;;  %v4168_v36 = vld [vmem:[#allocation4 + $0x74] ss:$8 sps:$4 sm:$0xff]  }
 0x142   : > { %v573_v38 = vpop.f32.mrf.mxu0 }
 0x144   : > { %v3939_v39 = vpop.f32.mrf.mxu0 }
 0x145   : > { %v3383_v40 = vpack.c.bf16 %v3939_v39, %v3938_v37  ;;  %v4201_v37 = vld [vmem:[#allocation4 + $0x34] ss:$8 sps:$4 sm:$0xff]   ;;  %v4203_v39 = vld [vmem:[#allocation4 + $0x30] ss:$8 sps:$4 sm:$0xff]  }
 0x146   : > { %v576_v41 = vpop.f32.mrf.mxu0  ;;  %v4152_v19 = vld [vmem:[#allocation2 + $0x18] sm:$0xff]  }
 0x147   : > { %3599 = vst [vmem:[#allocation2 + $0x28] sm:$0xff] %v3383_v40   ;;  %v3378_v42 = vpack.c.bf16 %v576_v41, %v573_v38  ;;  %v4170_v38 = vld [vmem:[#allocation4 + $0x70] ss:$8 sps:$4 sm:$0xff]   ;;  %v4171_v40 = vld [vmem:[#allocation4 + $0x84] ss:$8 sps:$4 sm:$0xff]  }
 0x148   : > { %v3942_v43 = vpop.f32.mrf.mxu0  ;;  %v4154_v21 = vld [vmem:[#allocation2 + $0x10] sm:$0xff]   ;;  %v4173_v41 = vld [vmem:[#allocation4 + $0x80] ss:$8 sps:$4 sm:$0xff]  }
 0x149   : > { %3598 = vst [vmem:[#allocation2 + $0x20] sm:$0xff] %v3378_v42   ;;  %v4174_v42 = vld [vmem:[#allocation4 + $0x94] ss:$8 sps:$4 sm:$0xff]  }
 0x14a   : > { %v589_v44 = vpop.f32.mrf.mxu0 }
 0x14c   : > { %v3943_v45 = vpop.f32.mrf.mxu0 }
 0x14d   : > { %v3393_v46 = vpack.c.bf16 %v3943_v45, %v3942_v43  ;;  %v4176_v43 = vld [vmem:[#allocation4 + $0x90] ss:$8 sps:$4 sm:$0xff]   ;;  %v4179_v45 = vld [vmem:[#allocation4 + $0xa0] ss:$8 sps:$4 sm:$0xff]  }
 0x14e   : > { %v592_v47 = vpop.f32.mrf.mxu0  ;;  %v4148_v15 = vld [vmem:[#allocation2 + $0x28] sm:$0xff]  }
 0x14f   : > { %3601 = vst [vmem:[#allocation2 + $0x38] sm:$0xff] %v3393_v46   ;;  %v3388_v48 = vpack.c.bf16 %v592_v47, %v589_v44  ;;  %v4177_v44 = vld [vmem:[#allocation4 + $0xa4] ss:$8 sps:$4 sm:$0xff]   ;;  %v4180_v46 = vld [vmem:[#allocation4 + $0xb4] ss:$8 sps:$4 sm:$0xff]  }
 0x150   : > { %v3946_v50 = vpop.f32.mrf.mxu0  ;;  %v4150_v17 = vld [vmem:[#allocation2 + $0x20] sm:$0xff]   ;;  %v4182_v47 = vld [vmem:[#allocation4 + $0xb0] ss:$8 sps:$4 sm:$0xff]  }
 0x151   : > { %3600 = vst [vmem:[#allocation2 + $0x30] sm:$0xff] %v3388_v48   ;;  %v4186_v48 = vld [vmem:[#allocation4 + $0xc4] ss:$8 sps:$4 sm:$0xff]  }
 0x152   : > { %v605_v51 = vpop.f32.mrf.mxu0 }
 0x154   : > { %v3947_v52 = vpop.f32.mrf.mxu0 }
 0x155   : > { %v3403_v53 = vpack.c.bf16 %v3947_v52, %v3946_v50  ;;  %v4192_v50 = vld [vmem:[#allocation4 + $0xd4] ss:$8 sps:$4 sm:$0xff]   ;;  %v4198_v52 = vld [vmem:[#allocation4 + $0xe4] ss:$8 sps:$4 sm:$0xff]  }
 0x156   : > { %v608_v54 = vpop.f32.mrf.mxu0  ;;  %v4144_v11 = vld [vmem:[#allocation2 + $0x38] sm:$0xff]  }
 0x157   : > { %3603 = vst [vmem:[#allocation2 + $0x48] sm:$0xff] %v3403_v53   ;;  %v3398_v55 = vpack.c.bf16 %v608_v54, %v605_v51  ;;  %v4194_v51 = vld [vmem:[#allocation4 + $0xd0] ss:$8 sps:$4 sm:$0xff]   ;;  %v4200_v53 = vld [vmem:[#allocation4 + $0xe0] ss:$8 sps:$4 sm:$0xff]  }
 0x158   : > { %v3950_v56 = vpop.f32.mrf.mxu0  ;;  %v4146_v13 = vld [vmem:[#allocation2 + $0x30] sm:$0xff]  }
 0x159   : > { %3602 = vst [vmem:[#allocation2 + $0x40] sm:$0xff] %v3398_v55   ;;  %v4204_v54 = vld [vmem:[#allocation4 + $0xf4] ss:$8 sps:$4 sm:$0xff]   ;;  %v4206_v55 = vld [vmem:[#allocation4 + $0xf0] ss:$8 sps:$4 sm:$0xff]  }
 0x15a   : > { %v621_v57 = vpop.f32.mrf.mxu0 }
 0x15c   : > { %v3951_v58 = vpop.f32.mrf.mxu0 }
 0x15d   : > { %v3413_v59 = vpack.c.bf16 %v3951_v58, %v3950_v56  ;;  %v4599_v56 = vmov 0.0  }
 0x15e   : > { %v624_v60 = vpop.f32.mrf.mxu0  ;;  %v4155_v22 = vld [vmem:[#allocation2 + $0x48] sm:$0xff]   ;;  %1512 = vst [vmem:[#allocation12] sm:$0xff] %v4599_v56  ;;  %1513 = vst [vmem:[#allocation12 + $0x8] sm:$0xff] %v4599_v56 }
 0x15f   : > { %3605 = vst [vmem:[#allocation2 + $0x58] sm:$0xff] %v3413_v59   ;;  %v3408_v61 = vpack.c.bf16 %v624_v60, %v621_v57  ;;  %1514 = vst [vmem:[#allocation12 + $0x10] sm:$0xff] %v4599_v56 }
 0x160   : > { %v3954_v62 = vpop.f32.mrf.mxu0  ;;  %v4157_v24 = vld [vmem:[#allocation2 + $0x40] sm:$0xff]   ;;  %1515 = vst [vmem:[#allocation12 + $0x18] sm:$0xff] %v4599_v56  ;;  %1516 = vst [vmem:[#allocation12 + $0x20] sm:$0xff] %v4599_v56 }
 0x161   : > { %3604 = vst [vmem:[#allocation2 + $0x50] sm:$0xff] %v3408_v61   ;;  %1517 = vst [vmem:[#allocation12 + $0x28] sm:$0xff] %v4599_v56  ;;  %v4744_v61 = vld [vmem:[%s5101_s3] ss:$0 sm:$0xff] }
 0x162   : > { %v637_v63 = vpop.f32.mrf.mxu0  ;;  %1518 = vst [vmem:[#allocation12 + $0x30] sm:$0xff] %v4599_v56  ;;  %1519 = vst [vmem:[#allocation12 + $0x38] sm:$0xff] %v4599_v56 }
 0x163   : > { %1520 = vst [vmem:[#allocation12 + $0x40] sm:$0xff] %v4599_v56  ;;  %1521 = vst [vmem:[#allocation12 + $0x48] sm:$0xff] %v4599_v56 }
 0x164   : > { %v3955_v0 = vpop.f32.mrf.mxu0  ;;  %1522 = vst [vmem:[#allocation12 + $0x50] sm:$0xff] %v4599_v56  ;;  %1523 = vst [vmem:[#allocation12 + $0x58] sm:$0xff] %v4599_v56 }
 0x165   : > { %v3423_v1 = vpack.c.bf16 %v3955_v0, %v3954_v62  ;;  %1524 = vst [vmem:[#allocation12 + $0x60] sm:$0xff] %v4599_v56  ;;  %1525 = vst [vmem:[#allocation12 + $0x68] sm:$0xff] %v4599_v56 }
 0x166   : > { %v640_v2 = vpop.f32.mrf.mxu0  ;;  %v4151_v18 = vld [vmem:[#allocation2 + $0x58] sm:$0xff]   ;;  %1526 = vst [vmem:[#allocation12 + $0x70] sm:$0xff] %v4599_v56  ;;  %1527 = vst [vmem:[#allocation12 + $0x78] sm:$0xff] %v4599_v56 }
 0x167   : > { %3607 = vst [vmem:[#allocation2 + $0x68] sm:$0xff] %v3423_v1   ;;  %v3418_v3 = vpack.c.bf16 %v640_v2, %v637_v63  ;;  %1528 = vst [vmem:[#allocation12 + $0x80] sm:$0xff] %v4599_v56 }
 0x168   : > { %v3958_v4 = vpop.f32.mrf.mxu0  ;;  %v4153_v20 = vld [vmem:[#allocation2 + $0x50] sm:$0xff]   ;;  %1529 = vst [vmem:[#allocation12 + $0x88] sm:$0xff] %v4599_v56  ;;  %1530 = vst [vmem:[#allocation12 + $0x90] sm:$0xff] %v4599_v56 }
 0x169   : > { %3606 = vst [vmem:[#allocation2 + $0x60] sm:$0xff] %v3418_v3   ;;  %1531 = vst [vmem:[#allocation12 + $0x98] sm:$0xff] %v4599_v56 }
 0x16a   : > { %v653_v5 = vpop.f32.mrf.mxu0  ;;  %1532 = vst [vmem:[#allocation12 + $0xa0] sm:$0xff] %v4599_v56  ;;  %1533 = vst [vmem:[#allocation12 + $0xa8] sm:$0xff] %v4599_v56 }
 0x16b   : > { %1534 = vst [vmem:[#allocation12 + $0xb0] sm:$0xff] %v4599_v56  ;;  %1535 = vst [vmem:[#allocation12 + $0xb8] sm:$0xff] %v4599_v56 }
 0x16c   : > { %v3959_v6 = vpop.f32.mrf.mxu0  ;;  %1536 = vst [vmem:[#allocation12 + $0xc0] sm:$0xff] %v4599_v56  ;;  %1537 = vst [vmem:[#allocation12 + $0xc8] sm:$0xff] %v4599_v56 }
 0x16d   : > { %v3433_v7 = vpack.c.bf16 %v3959_v6, %v3958_v4  ;;  %1538 = vst [vmem:[#allocation12 + $0xd0] sm:$0xff] %v4599_v56  ;;  %1539 = vst [vmem:[#allocation12 + $0xd8] sm:$0xff] %v4599_v56 }
 0x16e   : > { %v656_v8 = vpop.f32.mrf.mxu0  ;;  %v4147_v14 = vld [vmem:[#allocation2 + $0x68] sm:$0xff]   ;;  %1540 = vst [vmem:[#allocation12 + $0xe0] sm:$0xff] %v4599_v56  ;;  %1541 = vst [vmem:[#allocation12 + $0xe8] sm:$0xff] %v4599_v56 }
 0x16f   : > { %3609 = vst [vmem:[#allocation2 + $0x78] sm:$0xff] %v3433_v7   ;;  %v3428_v9 = vpack.c.bf16 %v656_v8, %v653_v5  ;;  %1542 = vst [vmem:[#allocation12 + $0xf0] sm:$0xff] %v4599_v56 }
 0x170   : > { %v4149_v16 = vld [vmem:[#allocation2 + $0x60] sm:$0xff]   ;;  %1543 = vst [vmem:[#allocation12 + $0xf8] sm:$0xff] %v4599_v56 }
 0x171   : > { %3608 = vst [vmem:[#allocation2 + $0x70] sm:$0xff] %v3428_v9  }
 0x176   : > { %v4143_v10 = vld [vmem:[#allocation2 + $0x78] sm:$0xff]  }
 0x177   : > { %3664 = vmatprep.subr.bf16.mxu0 %v4143_v10  ;;  %4008 = vmatprep.subr.bf16.mxu1 %v4143_v10 }
 0x178   : > { %v4145_v12 = vld [vmem:[#allocation2 + $0x70] sm:$0xff]   ;;  %3665 = vmatpush3.bf16.msra.mxu0 %v4144_v11  ;;  %4016 = vmatpush3.bf16.msra.mxu1 %v4144_v11 }
 0x179   : > { %3666 = vmatprep.subr.bf16.mxu0 %v4145_v12  ;;  %4009 = vmatprep.subr.bf16.mxu1 %v4145_v12 }
 0x17c   : > { %3667 = vmatpush3.bf16.msra.mxu0 %v4146_v13  ;;  %4017 = vmatpush3.bf16.msra.mxu1 %v4146_v13 }
 0x17d   : > { %3668 = vmatprep.subr.bf16.mxu0 %v4147_v14  ;;  %4010 = vmatprep.subr.bf16.mxu1 %v4147_v14 }
 0x180   : > { %3669 = vmatpush3.bf16.msra.mxu0 %v4148_v15  ;;  %4018 = vmatpush3.bf16.msra.mxu1 %v4148_v15 }
 0x181   : > { %3670 = vmatprep.subr.bf16.mxu0 %v4149_v16  ;;  %4011 = vmatprep.subr.bf16.mxu1 %v4149_v16 }
 0x184   : > { %3671 = vmatpush3.bf16.msra.mxu0 %v4150_v17  ;;  %4019 = vmatpush3.bf16.msra.mxu1 %v4150_v17 }
 0x185   : > { %3672 = vmatprep.subr.bf16.mxu0 %v4151_v18  ;;  %4012 = vmatprep.subr.bf16.mxu1 %v4151_v18 }
 0x188   : > { %3673 = vmatpush3.bf16.msra.mxu0 %v4152_v19  ;;  %4020 = vmatpush3.bf16.msra.mxu1 %v4152_v19 }
 0x189   : > { %3674 = vmatprep.subr.bf16.mxu0 %v4153_v20  ;;  %4013 = vmatprep.subr.bf16.mxu1 %v4153_v20 }
 0x18c   : > { %3675 = vmatpush3.bf16.msra.mxu0 %v4154_v21  ;;  %4021 = vmatpush3.bf16.msra.mxu1 %v4154_v21 }
 0x18d   : > { %3676 = vmatprep.subr.bf16.mxu0 %v4155_v22  ;;  %4014 = vmatprep.subr.bf16.mxu1 %v4155_v22 }
 0x190   : > { %3677 = vmatpush3.bf16.msra.mxu0 %v4156_v23  ;;  %4022 = vmatpush3.bf16.msra.mxu1 %v4156_v23 }
 0x191   : > { %3678 = vmatprep.subr.bf16.mxu0 %v4157_v24  ;;  %4015 = vmatprep.subr.bf16.mxu1 %v4157_v24 }
 0x194   : > { %3679 = vmatpush3.bf16.msra.mxu0 %v4158_v25  ;;  %4023 = vmatpush3.bf16.msra.mxu1 %v4158_v25 }
 0x197   : > { %1220 = vmatmul.mubr.bf16.vlgmr.msra.gmra.mxu1 %v4159_v26  ;;  %1188 = vmatmul.mubr.bf16.vlgmr.msra.gmra.mxu0 %v4183_v27 }
 0x198   : > { %1227 = vmatprep.mubr.bf16.mxu1 %v4162_v28  ;;  %1195 = vmatprep.mubr.bf16.mxu0 %v4189_v29 }
 0x19f   : > { %1228 = vmatmul.mubr.bf16.gmra.mxu1 %v4164_v30  ;;  %1196 = vmatmul.mubr.bf16.gmra.mxu0 %v4191_v31 }
 0x1a0   : > { %1235 = vmatprep.mubr.bf16.mxu1 %v4165_v32  ;;  %1203 = vmatprep.mubr.bf16.mxu0 %v4195_v33 }
 0x1a7   : > { %1236 = vmatmul.mubr.bf16.gmra.mxu1 %v4167_v34  ;;  %1204 = vmatmul.mubr.bf16.gmra.mxu0 %v4197_v35 }
 0x1a8   : > { %1243 = vmatprep.mubr.bf16.mxu1 %v4168_v36  ;;  %1211 = vmatprep.mubr.bf16.mxu0 %v4201_v37 }
 0x1af   : > { %1244 = vmatmul.mubr.bf16.gmra.mxu1 %v4170_v38  ;;  %1212 = vmatmul.mubr.bf16.gmra.mxu0 %v4203_v39 }
 0x1b0   : > { %1251 = vmatprep.mubr.bf16.mxu1 %v4171_v40 }
 0x1b7   : > { %1252 = vmatmul.mubr.bf16.gmra.mxu1 %v4173_v41 }
 0x1b8   : > { %1259 = vmatprep.mubr.bf16.mxu1 %v4174_v42 }
 0x1bf   : > { %1260 = vmatmul.mubr.bf16.gmra.mxu1 %v4176_v43 }
 0x1c0   : > { %1267 = vmatprep.mubr.bf16.mxu1 %v4177_v44 }
 0x1c7   : > { %1268 = vmatmul.mubr.bf16.gmra.mxu1 %v4179_v45 }
 0x1c8   : > { %1275 = vmatprep.mubr.bf16.mxu1 %v4180_v46 }
 0x1cf   : > { %1276 = vmatmul.mubr.bf16.gmra.mxu1 %v4182_v47 }
 0x1d0   : > { %1283 = vmatprep.mubr.bf16.mxu1 %v4186_v48 }
 0x1d7   : > { %1284 = vmatmul.mubr.bf16.gmra.mxu1 %v4188_v49 }
 0x1d8   : > { %1291 = vmatprep.mubr.bf16.mxu1 %v4192_v50 }
 0x1df   : > { %1292 = vmatmul.mubr.bf16.gmra.mxu1 %v4194_v51 }
 0x1e0   : > { %1299 = vmatprep.mubr.bf16.mxu1 %v4198_v52 }
 0x1e7   : > { %1300 = vmatmul.mubr.bf16.gmra.mxu1 %v4200_v53 }
 0x1e8   : > { %1307 = vmatprep.mubr.bf16.mxu1 %v4204_v54 }
 0x1ef   : > { %1308 = vmatmul.mubr.bf16.gmra.mxu1 %v4206_v55 }
 0x257   : > { %v3704_v57 = vpop.f32.mrf.mxu1  ;;  %v3680_v58 = vpop.f32.mrf.mxu0 }
 0x259   : > { %v3705_v59 = vpop.f32.mrf.mxu1  ;;  %v3681_v60 = vpop.f32.mrf.mxu0 }
 0x25a   : > { %v3706_v62 = vadd.f32 %v3705_v59, %v3704_v57  ;;  %v3682_v63 = vadd.f32 %v3681_v60, %v3680_v58 }
 0x25b   : > { %v3707_v0 = vpop.f32.mrf.mxu1  ;;  %v3683_v1 = vpop.f32.mrf.mxu0 }
 0x25c   : > { %v1190_v2 = vadd.f32 %v3682_v63, %v4744_v61  ;;  %v1222_v3 = vadd.f32 %v3706_v62, %v4744_v61 }
 0x25d   : > { %v3708_v4 = vpop.f32.mrf.mxu1  ;;  %v3684_v5 = vpop.f32.mrf.mxu0 }
 0x25e   : > { %v3709_v6 = vadd.f32 %v3708_v4, %v3707_v0  ;;  %v3685_v7 = vadd.f32 %v3684_v5, %v3683_v1  ;;  %v1316_v11 = vmax.f32 %v1190_v2, 0.0  ;;  %v1324_v13 = vmax.f32 %v1222_v3, 0.0 }
 0x25f   : > { %v3710_v8 = vpop.f32.mrf.mxu1  ;;  %v3686_v9 = vpop.f32.mrf.mxu0 }
 0x260   : > { %v1225_v10 = vadd.f32 %v3709_v6, %v4744_v61  ;;  %v1193_v12 = vadd.f32 %v3685_v7, %v4744_v61 }
 0x261   : > { %v3711_v14 = vpop.f32.mrf.mxu1  ;;  %v3687_v15 = vpop.f32.mrf.mxu0 }
 0x262   : > { %v1325_v16 = vmax.f32 %v1225_v10, 0.0  ;;  %v3712_v17 = vadd.f32 %v3711_v14, %v3710_v8  ;;  %v1317_v18 = vmax.f32 %v1193_v12, 0.0  ;;  %v3688_v19 = vadd.f32 %v3687_v15, %v3686_v9 }
 0x263   : > { %v3713_v20 = vpop.f32.mrf.mxu1  ;;  %v3689_v21 = vpop.f32.mrf.mxu0 }
 0x264   : > { %v3458_v22 = vpack.c.bf16 %v1325_v16, %v1324_v13  ;;  %v3438_v23 = vpack.c.bf16 %v1317_v18, %v1316_v11  ;;  %v1198_v24 = vadd.f32 %v3688_v19, %v4744_v61  ;;  %v1230_v25 = vadd.f32 %v3712_v17, %v4744_v61 }
 0x265   : > { %v3714_v26 = vpop.f32.mrf.mxu1  ;;  %v3690_v27 = vpop.f32.mrf.mxu0 }
 0x266   : > { %3613 = vst [vmem:[#allocation3 + $0x20] sm:$0xff] %v3458_v22   ;;  %v3715_v28 = vadd.f32 %v3714_v26, %v3713_v20  ;;  %3439 = vst [vmem:[#allocation3] sm:$0xff] %v3438_v23   ;;  %v3691_v29 = vadd.f32 %v3690_v27, %v3689_v21  ;;  %v1318_v33 = vmax.f32 %v1198_v24, 0.0  ;;  %v1326_v35 = vmax.f32 %v1230_v25, 0.0 }
 0x267   : > { %v3716_v30 = vpop.f32.mrf.mxu1  ;;  %v3692_v31 = vpop.f32.mrf.mxu0 }
 0x268   : > { %v1233_v32 = vadd.f32 %v3715_v28, %v4744_v61  ;;  %v1201_v34 = vadd.f32 %v3691_v29, %v4744_v61 }
 0x269   : > { %v3717_v36 = vpop.f32.mrf.mxu1  ;;  %v3693_v37 = vpop.f32.mrf.mxu0 }
 0x26a   : > { %v1327_v38 = vmax.f32 %v1233_v32, 0.0  ;;  %v3718_v39 = vadd.f32 %v3717_v36, %v3716_v30  ;;  %v1319_v40 = vmax.f32 %v1201_v34, 0.0  ;;  %v3694_v41 = vadd.f32 %v3693_v37, %v3692_v31 }
 0x26b   : > { %v3719_v42 = vpop.f32.mrf.mxu1  ;;  %v3695_v43 = vpop.f32.mrf.mxu0 }
 0x26c   : > { %v3463_v44 = vpack.c.bf16 %v1327_v38, %v1326_v35  ;;  %v3443_v45 = vpack.c.bf16 %v1319_v40, %v1318_v33  ;;  %v1206_v46 = vadd.f32 %v3694_v41, %v4744_v61  ;;  %v1238_v47 = vadd.f32 %v3718_v39, %v4744_v61 }
 0x26d   : > { %v3720_v48 = vpop.f32.mrf.mxu1  ;;  %v3696_v49 = vpop.f32.mrf.mxu0 }
 0x26e   : > { %3614 = vst [vmem:[#allocation3 + $0x28] sm:$0xff] %v3463_v44   ;;  %v3721_v50 = vadd.f32 %v3720_v48, %v3719_v42  ;;  %3610 = vst [vmem:[#allocation3 + $0x8] sm:$0xff] %v3443_v45   ;;  %v3697_v51 = vadd.f32 %v3696_v49, %v3695_v43  ;;  %v1320_v55 = vmax.f32 %v1206_v46, 0.0  ;;  %v1328_v57 = vmax.f32 %v1238_v47, 0.0 }
 0x26f   : > { %v3722_v52 = vpop.f32.mrf.mxu1  ;;  %v3698_v53 = vpop.f32.mrf.mxu0 }
 0x270   : > { %v1241_v54 = vadd.f32 %v3721_v50, %v4744_v61  ;;  %v1209_v56 = vadd.f32 %v3697_v51, %v4744_v61 }
 0x271   : > { %v3723_v58 = vpop.f32.mrf.mxu1  ;;  %v3699_v59 = vpop.f32.mrf.mxu0 }
 0x272   : > { %v1329_v60 = vmax.f32 %v1241_v54, 0.0  ;;  %v3724_v62 = vadd.f32 %v3723_v58, %v3722_v52  ;;  %v1321_v63 = vmax.f32 %v1209_v56, 0.0  ;;  %v3700_v0 = vadd.f32 %v3699_v59, %v3698_v53 }
 0x273   : > { %v3725_v1 = vpop.f32.mrf.mxu1  ;;  %v3701_v2 = vpop.f32.mrf.mxu0 }
 0x274   : > { %v3468_v3 = vpack.c.bf16 %v1329_v60, %v1328_v57  ;;  %v3448_v4 = vpack.c.bf16 %v1321_v63, %v1320_v55  ;;  %v1214_v5 = vadd.f32 %v3700_v0, %v4744_v61  ;;  %v1246_v8 = vadd.f32 %v3724_v62, %v4744_v61 }
 0x275   : > { %v3726_v6 = vpop.f32.mrf.mxu1  ;;  %v3702_v7 = vpop.f32.mrf.mxu0 }
 0x276   : > { %3615 = vst [vmem:[#allocation3 + $0x30] sm:$0xff] %v3468_v3   ;;  %v3727_v9 = vadd.f32 %v3726_v6, %v3725_v1  ;;  %3611 = vst [vmem:[#allocation3 + $0x10] sm:$0xff] %v3448_v4   ;;  %v3703_v10 = vadd.f32 %v3702_v7, %v3701_v2  ;;  %v1322_v13 = vmax.f32 %v1214_v5, 0.0  ;;  %v1330_v16 = vmax.f32 %v1246_v8, 0.0 }
 0x277   : > { %v3728_v11 = vpop.f32.mrf.mxu1 }
 0x278   : > { %v1249_v12 = vadd.f32 %v3727_v9, %v4744_v61  ;;  %v1217_v14 = vadd.f32 %v3703_v10, %v4744_v61 }
 0x279   : > { %v3729_v15 = vpop.f32.mrf.mxu1 }
 0x27a   : > { %v1331_v17 = vmax.f32 %v1249_v12, 0.0  ;;  %v3730_v18 = vadd.f32 %v3729_v15, %v3728_v11  ;;  %v1323_v19 = vmax.f32 %v1217_v14, 0.0 }
 0x27b   : > { %v3731_v20 = vpop.f32.mrf.mxu1 }
 0x27c   : > { %v3473_v21 = vpack.c.bf16 %v1331_v17, %v1330_v16  ;;  %v3453_v22 = vpack.c.bf16 %v1323_v19, %v1322_v13  ;;  %v1254_v24 = vadd.f32 %v3730_v18, %v4744_v61 }
 0x27d   : > { %v3732_v23 = vpop.f32.mrf.mxu1 }
 0x27e   : > { %3616 = vst [vmem:[#allocation3 + $0x38] sm:$0xff] %v3473_v21   ;;  %v3733_v25 = vadd.f32 %v3732_v23, %v3731_v20  ;;  %3612 = vst [vmem:[#allocation3 + $0x18] sm:$0xff] %v3453_v22   ;;  %v1332_v29 = vmax.f32 %v1254_v24, 0.0 }
 0x27f   : > { %v3734_v26 = vpop.f32.mrf.mxu1 }
 0x280   : > { %v1257_v27 = vadd.f32 %v3733_v25, %v4744_v61 }
 0x281   : > { %v3735_v28 = vpop.f32.mrf.mxu1 }
 0x282   : > { %v1333_v30 = vmax.f32 %v1257_v27, 0.0  ;;  %v3736_v31 = vadd.f32 %v3735_v28, %v3734_v26 }
 0x283   : > { %v3737_v32 = vpop.f32.mrf.mxu1 }
 0x284   : > { %v3478_v33 = vpack.c.bf16 %v1333_v30, %v1332_v29  ;;  %v1262_v35 = vadd.f32 %v3736_v31, %v4744_v61 }
 0x285   : > { %v3738_v34 = vpop.f32.mrf.mxu1 }
 0x286   : > { %3617 = vst [vmem:[#allocation3 + $0x40] sm:$0xff] %v3478_v33   ;;  %v3739_v36 = vadd.f32 %v3738_v34, %v3737_v32  ;;  %v1334_v40 = vmax.f32 %v1262_v35, 0.0 }
 0x287   : > { %v3740_v37 = vpop.f32.mrf.mxu1 }
 0x288   : > { %v1265_v38 = vadd.f32 %v3739_v36, %v4744_v61 }
 0x289   : > { %v3741_v39 = vpop.f32.mrf.mxu1 }
 0x28a   : > { %v1335_v41 = vmax.f32 %v1265_v38, 0.0  ;;  %v3742_v42 = vadd.f32 %v3741_v39, %v3740_v37 }
 0x28b   : > { %v3743_v43 = vpop.f32.mrf.mxu1 }
 0x28c   : > { %v3483_v44 = vpack.c.bf16 %v1335_v41, %v1334_v40  ;;  %v1270_v46 = vadd.f32 %v3742_v42, %v4744_v61 }
 0x28d   : > { %v3744_v45 = vpop.f32.mrf.mxu1 }
 0x28e   : > { %3618 = vst [vmem:[#allocation3 + $0x48] sm:$0xff] %v3483_v44   ;;  %v3745_v47 = vadd.f32 %v3744_v45, %v3743_v43  ;;  %v1336_v51 = vmax.f32 %v1270_v46, 0.0 }
 0x28f   : > { %v3746_v48 = vpop.f32.mrf.mxu1 }
 0x290   : > { %v1273_v49 = vadd.f32 %v3745_v47, %v4744_v61 }
 0x291   : > { %v3747_v50 = vpop.f32.mrf.mxu1 }
 0x292   : > { %v1337_v52 = vmax.f32 %v1273_v49, 0.0  ;;  %v3748_v53 = vadd.f32 %v3747_v50, %v3746_v48 }
 0x293   : > { %v3749_v54 = vpop.f32.mrf.mxu1 }
 0x294   : > { %v3488_v55 = vpack.c.bf16 %v1337_v52, %v1336_v51  ;;  %v1278_v57 = vadd.f32 %v3748_v53, %v4744_v61 }
 0x295   : > { %v3750_v56 = vpop.f32.mrf.mxu1 }
 0x296   : > { %3619 = vst [vmem:[#allocation3 + $0x50] sm:$0xff] %v3488_v55   ;;  %v3751_v58 = vadd.f32 %v3750_v56, %v3749_v54  ;;  %v1338_v63 = vmax.f32 %v1278_v57, 0.0 }
 0x297   : > { %v3752_v59 = vpop.f32.mrf.mxu1 }
 0x298   : > { %v1281_v60 = vadd.f32 %v3751_v58, %v4744_v61 }
 0x299   : > { %v3753_v62 = vpop.f32.mrf.mxu1 }
 0x29a   : > { %v1339_v0 = vmax.f32 %v1281_v60, 0.0  ;;  %v3754_v1 = vadd.f32 %v3753_v62, %v3752_v59 }
 0x29b   : > { %v3755_v2 = vpop.f32.mrf.mxu1 }
 0x29c   : > { %v3493_v3 = vpack.c.bf16 %v1339_v0, %v1338_v63  ;;  %v1286_v5 = vadd.f32 %v3754_v1, %v4744_v61 }
 0x29d   : > { %v3756_v4 = vpop.f32.mrf.mxu1 }
 0x29e   : > { %3620 = vst [vmem:[#allocation3 + $0x58] sm:$0xff] %v3493_v3   ;;  %v3757_v6 = vadd.f32 %v3756_v4, %v3755_v2  ;;  %v1340_v10 = vmax.f32 %v1286_v5, 0.0 }
 0x29f   : > { %v3758_v7 = vpop.f32.mrf.mxu1 }
 0x2a0   : > { %v1289_v8 = vadd.f32 %v3757_v6, %v4744_v61 }
 0x2a1   : > { %v3759_v9 = vpop.f32.mrf.mxu1 }
 0x2a2   : > { %v1341_v11 = vmax.f32 %v1289_v8, 0.0  ;;  %v3760_v12 = vadd.f32 %v3759_v9, %v3758_v7 }
 0x2a3   : > { %v3761_v13 = vpop.f32.mrf.mxu1 }
 0x2a4   : > { %v3498_v14 = vpack.c.bf16 %v1341_v11, %v1340_v10  ;;  %v1294_v16 = vadd.f32 %v3760_v12, %v4744_v61 }
 0x2a5   : > { %v3762_v15 = vpop.f32.mrf.mxu1 }
 0x2a6   : > { %3621 = vst [vmem:[#allocation3 + $0x60] sm:$0xff] %v3498_v14   ;;  %v3763_v17 = vadd.f32 %v3762_v15, %v3761_v13  ;;  %v1342_v21 = vmax.f32 %v1294_v16, 0.0 }
 0x2a7   : > { %v3764_v18 = vpop.f32.mrf.mxu1 }
 0x2a8   : > { %v1297_v19 = vadd.f32 %v3763_v17, %v4744_v61 }
 0x2a9   : > { %v3765_v20 = vpop.f32.mrf.mxu1 }
 0x2aa   : > { %v1343_v22 = vmax.f32 %v1297_v19, 0.0  ;;  %v3766_v23 = vadd.f32 %v3765_v20, %v3764_v18 }
 0x2ab   : > { %v3767_v24 = vpop.f32.mrf.mxu1 }
 0x2ac   : > { %v3503_v25 = vpack.c.bf16 %v1343_v22, %v1342_v21  ;;  %v1302_v27 = vadd.f32 %v3766_v23, %v4744_v61 }
 0x2ad   : > { %v3768_v26 = vpop.f32.mrf.mxu1 }
 0x2ae   : > { %3622 = vst [vmem:[#allocation3 + $0x68] sm:$0xff] %v3503_v25   ;;  %v3769_v28 = vadd.f32 %v3768_v26, %v3767_v24  ;;  %v1344_v32 = vmax.f32 %v1302_v27, 0.0 }
 0x2af   : > { %v3770_v29 = vpop.f32.mrf.mxu1 }
 0x2b0   : > { %v1305_v30 = vadd.f32 %v3769_v28, %v4744_v61 }
 0x2b1   : > { %v3771_v31 = vpop.f32.mrf.mxu1 }
 0x2b2   : > { %v1345_v33 = vmax.f32 %v1305_v30, 0.0  ;;  %v3772_v34 = vadd.f32 %v3771_v31, %v3770_v29 }
 0x2b3   : > { %v3773_v35 = vpop.f32.mrf.mxu1 }
 0x2b4   : > { %v3508_v36 = vpack.c.bf16 %v1345_v33, %v1344_v32  ;;  %v1310_v38 = vadd.f32 %v3772_v34, %v4744_v61 }
 0x2b5   : > { %v3774_v37 = vpop.f32.mrf.mxu1 }
 0x2b6   : > { %3623 = vst [vmem:[#allocation3 + $0x70] sm:$0xff] %v3508_v36   ;;  %v3775_v39 = vadd.f32 %v3774_v37, %v3773_v35  ;;  %v1346_v41 = vmax.f32 %v1310_v38, 0.0 }
 0x2b8   : > { %v1313_v40 = vadd.f32 %v3775_v39, %v4744_v61 }
 0x2ba   : > { %v1347_v42 = vmax.f32 %v1313_v40, 0.0 }
 0x2bc   : > { %v3513_v43 = vpack.c.bf16 %v1347_v42, %v1346_v41 }
 0x2be   : > { %3624 = vst [vmem:[#allocation3 + $0x78] sm:$0xff] %v3513_v43  }
 0x2bf PF: > { %p3149_p2 = scmp.ne.s32.totalorder %s4581_s21, 1 }
 0x2c1   : > { %1547 = sbr.rel (%p3149_p2) target bundleno = 1642 (0x66a), region = 72 }
 0x2c6   : > { %v4207_v44 = vld [vmem:[#allocation10 + $0x38] sm:$0xff]   ;;  %v4208_v45 = vld [vmem:[#allocation10 + $0x30] sm:$0xff]   ;;  %v4209_v46 = vld [vmem:[#allocation10 + $0x28] sm:$0xff]  }
 0x2c7   : > { %3960 = vmatprep.subr.bf16.mxu0 %v4207_v44  ;;  %v4210_v47 = vld [vmem:[#allocation10 + $0x20] sm:$0xff]   ;;  %v4211_v61 = vld [vmem:[#allocation10 + $0x18] sm:$0xff]   ;;  %v4212_v49 = vld [vmem:[#allocation10 + $0x10] sm:$0xff]  }
 0x2c8   : > { %3961 = vmatpush3.bf16.msra.mxu0 %v4207_v44  ;;  %v4215_v48 = vld [vmem:[#allocation3] sm:$0xff]   ;;  %v4213_v50 = vld [vmem:[#allocation10 + $0x8] sm:$0xff]   ;;  %v4217_v53 = vld [vmem:[#allocation3 + $0x10] sm:$0xff]  }
 0x2c9   : > { %3962 = vmatprep.subr.bf16.mxu0 %v4208_v45  ;;  %3976 = vmatprep.mubr.bf16.mxu0 %v4215_v48  ;;  %v4214_v51 = vld [vmem:[#allocation10] sm:$0xff]   ;;  %v4216_v52 = vld [vmem:[#allocation3 + $0x8] sm:$0xff]   ;;  %v4218_v54 = vld [vmem:[#allocation3 + $0x18] sm:$0xff]  }
 0x2ca   : > { %v4219_v55 = vld [vmem:[#allocation3 + $0x20] sm:$0xff]   ;;  %v4220_v56 = vld [vmem:[#allocation3 + $0x28] sm:$0xff]   ;;  %v4221_v57 = vld [vmem:[#allocation3 + $0x30] sm:$0xff]  }
 0x2cb   : > { %v4222_v58 = vld [vmem:[#allocation3 + $0x38] sm:$0xff]   ;;  %v4223_v59 = vld [vmem:[#allocation3 + $0x40] sm:$0xff]   ;;  %v4224_v60 = vld [vmem:[#allocation3 + $0x48] sm:$0xff]  }
 0x2cc   : > { %3963 = vmatpush3.bf16.msra.mxu0 %v4208_v45  ;;  %v4225_v62 = vld [vmem:[#allocation3 + $0x50] sm:$0xff]   ;;  %v4226_v63 = vld [vmem:[#allocation3 + $0x58] sm:$0xff]   ;;  %v4227_v0 = vld [vmem:[#allocation3 + $0x60] sm:$0xff]  }
 0x2cd   : > { %3964 = vmatprep.subr.bf16.mxu0 %v4209_v46  ;;  %v4228_v1 = vld [vmem:[#allocation3 + $0x68] sm:$0xff]   ;;  %v4229_v2 = vld [vmem:[#allocation3 + $0x70] sm:$0xff]   ;;  %v4230_v3 = vld [vmem:[#allocation3 + $0x78] sm:$0xff]  }
 0x2ce   : > { %v4249_v4 = vld [vmem:[#allocation4 + $0x4] ss:$8 sps:$4 sm:$0xff]  }
 0x2cf   : > { %v4252_v5 = vld [vmem:[#allocation4 + $0x44] ss:$8 sps:$4 sm:$0xff]  }
 0x2d0   : > { %3965 = vmatpush3.bf16.msra.mxu0 %v4209_v46  ;;  %2456 = vmatprep.mubr.bf16.mxu1 %v4252_v5 }
 0x2d1   : > { %3966 = vmatprep.subr.bf16.mxu0 %v4210_v47 }
 0x2d4   : > { %3967 = vmatpush3.bf16.msra.mxu0 %v4210_v47 }
 0x2d5   : > { %3968 = vmatprep.subr.bf16.mxu0 %v4211_v61 }
 0x2d8   : > { %3969 = vmatpush3.bf16.msra.mxu0 %v4211_v61 }
 0x2d9   : > { %3970 = vmatprep.subr.bf16.mxu0 %v4212_v49 }
 0x2dc   : > { %3971 = vmatpush3.bf16.msra.mxu0 %v4212_v49 }
 0x2dd   : > { %3972 = vmatprep.subr.bf16.mxu0 %v4213_v50 }
 0x2e0   : > { %3973 = vmatpush3.bf16.msra.mxu0 %v4213_v50 }
 0x2e1   : > { %3974 = vmatprep.subr.bf16.mxu0 %v4214_v51 }
 0x2e4   : > { %3975 = vmatpush3.bf16.msra.mxu0 %v4214_v51 }
 0x2e7   : > { %3977 = vmatmul.mubr.bf16.vlgmr.msra.gmra.mxu0 %v4216_v52 }
 0x2e8   : > { %3980 = vmatprep.mubr.bf16.mxu0 %v4217_v53 }
 0x2ef   : > { %3981 = vmatmul.mubr.bf16.gmra.mxu0 %v4218_v54 }
 0x2f0   : > { %3984 = vmatprep.mubr.bf16.mxu0 %v4219_v55 }
 0x2f7   : > { %3985 = vmatmul.mubr.bf16.gmra.mxu0 %v4220_v56 }
 0x2f8   : > { %3988 = vmatprep.mubr.bf16.mxu0 %v4221_v57 }
 0x2ff   : > { %3989 = vmatmul.mubr.bf16.gmra.mxu0 %v4222_v58 }
 0x300   : > { %3992 = vmatprep.mubr.bf16.mxu0 %v4223_v59 }
 0x307   : > { %3993 = vmatmul.mubr.bf16.gmra.mxu0 %v4224_v60 }
 0x308   : > { %3996 = vmatprep.mubr.bf16.mxu0 %v4225_v62 }
 0x30f   : > { %3997 = vmatmul.mubr.bf16.gmra.mxu0 %v4226_v63 }
 0x310   : > { %4000 = vmatprep.mubr.bf16.mxu0 %v4227_v0 }
 0x317   : > { %4001 = vmatmul.mubr.bf16.gmra.mxu0 %v4228_v1 }
 0x318   : > { %4004 = vmatprep.mubr.bf16.mxu0 %v4229_v2 }
 0x31f   : > { %4005 = vmatmul.mubr.bf16.gmra.mxu0 %v4230_v3 }
 0x320   : > { %2424 = vmatprep.mubr.bf16.mxu0 %v4249_v4 }
 0x3a7   : > { %v3978_v6 = vpop.f32.mrf.mxu0 }
 0x3a9   : > { %v1778_v7 = vpop.f32.mrf.mxu0 }
 0x3ab   : > { %v3979_v8 = vpop.f32.mrf.mxu0 }
 0x3ac   : > { %v3523_v9 = vpack.c.bf16 %v3979_v8, %v3978_v6  ;;  %v4247_v6 = vld [vmem:[#allocation4] ss:$8 sps:$4 sm:$0xff]   ;;  %v4253_v8 = vld [vmem:[#allocation4 + $0x14] ss:$8 sps:$4 sm:$0xff]  }
 0x3ad   : > { %v1781_v10 = vpop.f32.mrf.mxu0 }
 0x3ae   : > { %3625 = vst [vmem:[#allocation2 + $0x8] sm:$0xff] %v3523_v9   ;;  %v3518_v11 = vpack.c.bf16 %v1781_v10, %v1778_v7  ;;  %v4250_v7 = vld [vmem:[#allocation4 + $0x40] ss:$8 sps:$4 sm:$0xff]   ;;  %v4255_v9 = vld [vmem:[#allocation4 + $0x54] ss:$8 sps:$4 sm:$0xff]  }
 0x3af   : > { %v3982_v12 = vpop.f32.mrf.mxu0  ;;  %v4257_v10 = vld [vmem:[#allocation4 + $0x10] ss:$8 sps:$4 sm:$0xff]  }
 0x3b0   : > { %3519 = vst [vmem:[#allocation2] sm:$0xff] %v3518_v11   ;;  %v4258_v11 = vld [vmem:[#allocation4 + $0x50] ss:$8 sps:$4 sm:$0xff]  }
 0x3b1   : > { %v1794_v13 = vpop.f32.mrf.mxu0 }
 0x3b3   : > { %v3983_v14 = vpop.f32.mrf.mxu0 }
 0x3b4   : > { %v3533_v15 = vpack.c.bf16 %v3983_v14, %v3982_v12  ;;  %v4259_v12 = vld [vmem:[#allocation4 + $0x24] ss:$8 sps:$4 sm:$0xff]   ;;  %v4263_v14 = vld [vmem:[#allocation4 + $0x20] ss:$8 sps:$4 sm:$0xff]  }
 0x3b5   : > { %v1797_v16 = vpop.f32.mrf.mxu0  ;;  %v4244_v3 = vld [vmem:[#allocation2 + $0x8] sm:$0xff]  }
 0x3b6   : > { %3627 = vst [vmem:[#allocation2 + $0x18] sm:$0xff] %v3533_v15   ;;  %v3528_v17 = vpack.c.bf16 %v1797_v16, %v1794_v13  ;;  %v4261_v13 = vld [vmem:[#allocation4 + $0x64] ss:$8 sps:$4 sm:$0xff]   ;;  %v4264_v15 = vld [vmem:[#allocation4 + $0x60] ss:$8 sps:$4 sm:$0xff]  }
 0x3b7   : > { %v3986_v18 = vpop.f32.mrf.mxu0  ;;  %v4246_v5 = vld [vmem:[#allocation2] sm:$0xff]   ;;  %v4265_v16 = vld [vmem:[#allocation4 + $0x34] ss:$8 sps:$4 sm:$0xff]  }
 0x3b8   : > { %3626 = vst [vmem:[#allocation2 + $0x10] sm:$0xff] %v3528_v17   ;;  %v4267_v17 = vld [vmem:[#allocation4 + $0x74] ss:$8 sps:$4 sm:$0xff]  }
 0x3b9   : > { %v1810_v19 = vpop.f32.mrf.mxu0 }
 0x3bb   : > { %v3987_v20 = vpop.f32.mrf.mxu0 }
 0x3bc   : > { %v3543_v21 = vpack.c.bf16 %v3987_v20, %v3986_v18  ;;  %v4269_v18 = vld [vmem:[#allocation4 + $0x30] ss:$8 sps:$4 sm:$0xff]   ;;  %v4271_v20 = vld [vmem:[#allocation4 + $0x84] ss:$8 sps:$4 sm:$0xff]  }
 0x3bd   : > { %v1813_v22 = vpop.f32.mrf.mxu0  ;;  %v4240_v63 = vld [vmem:[#allocation2 + $0x18] sm:$0xff]  }
 0x3be   : > { %3629 = vst [vmem:[#allocation2 + $0x28] sm:$0xff] %v3543_v21   ;;  %v3538_v23 = vpack.c.bf16 %v1813_v22, %v1810_v19  ;;  %v4270_v19 = vld [vmem:[#allocation4 + $0x70] ss:$8 sps:$4 sm:$0xff]   ;;  %v4273_v21 = vld [vmem:[#allocation4 + $0x80] ss:$8 sps:$4 sm:$0xff]  }
 0x3bf   : > { %v3990_v24 = vpop.f32.mrf.mxu0  ;;  %v4242_v1 = vld [vmem:[#allocation2 + $0x10] sm:$0xff]  }
 0x3c0   : > { %3628 = vst [vmem:[#allocation2 + $0x20] sm:$0xff] %v3538_v23   ;;  %v4274_v22 = vld [vmem:[#allocation4 + $0x94] ss:$8 sps:$4 sm:$0xff]   ;;  %v4276_v23 = vld [vmem:[#allocation4 + $0x90] ss:$8 sps:$4 sm:$0xff]  }
 0x3c1   : > { %v1826_v25 = vpop.f32.mrf.mxu0 }
 0x3c3   : > { %v3991_v26 = vpop.f32.mrf.mxu0 }
 0x3c4   : > { %v3553_v27 = vpack.c.bf16 %v3991_v26, %v3990_v24  ;;  %v4277_v24 = vld [vmem:[#allocation4 + $0xa4] ss:$8 sps:$4 sm:$0xff]   ;;  %v4280_v26 = vld [vmem:[#allocation4 + $0xb4] ss:$8 sps:$4 sm:$0xff]  }
 0x3c5   : > { %v1829_v28 = vpop.f32.mrf.mxu0  ;;  %v4236_v58 = vld [vmem:[#allocation2 + $0x28] sm:$0xff]  }
 0x3c6   : > { %3631 = vst [vmem:[#allocation2 + $0x38] sm:$0xff] %v3553_v27   ;;  %v3548_v29 = vpack.c.bf16 %v1829_v28, %v1826_v25  ;;  %v4279_v25 = vld [vmem:[#allocation4 + $0xa0] ss:$8 sps:$4 sm:$0xff]   ;;  %v4282_v27 = vld [vmem:[#allocation4 + $0xb0] ss:$8 sps:$4 sm:$0xff]  }
 0x3c7   : > { %v3994_v30 = vpop.f32.mrf.mxu0  ;;  %v4238_v60 = vld [vmem:[#allocation2 + $0x20] sm:$0xff]  }
 0x3c8   : > { %3630 = vst [vmem:[#allocation2 + $0x30] sm:$0xff] %v3548_v29   ;;  %v4283_v28 = vld [vmem:[#allocation4 + $0xc4] ss:$8 sps:$4 sm:$0xff]   ;;  %v4285_v29 = vld [vmem:[#allocation4 + $0xc0] ss:$8 sps:$4 sm:$0xff]  }
 0x3c9   : > { %v1842_v31 = vpop.f32.mrf.mxu0 }
 0x3cb   : > { %v3995_v32 = vpop.f32.mrf.mxu0 }
 0x3cc   : > { %v3563_v33 = vpack.c.bf16 %v3995_v32, %v3994_v30  ;;  %v4286_v30 = vld [vmem:[#allocation4 + $0xd4] ss:$8 sps:$4 sm:$0xff]   ;;  %v4289_v32 = vld [vmem:[#allocation4 + $0xe4] ss:$8 sps:$4 sm:$0xff]  }
 0x3cd   : > { %v1845_v34 = vpop.f32.mrf.mxu0  ;;  %v4232_v54 = vld [vmem:[#allocation2 + $0x38] sm:$0xff]  }
 0x3ce   : > { %3633 = vst [vmem:[#allocation2 + $0x48] sm:$0xff] %v3563_v33   ;;  %v3558_v35 = vpack.c.bf16 %v1845_v34, %v1842_v31  ;;  %v4288_v31 = vld [vmem:[#allocation4 + $0xd0] ss:$8 sps:$4 sm:$0xff]   ;;  %v4291_v33 = vld [vmem:[#allocation4 + $0xe0] ss:$8 sps:$4 sm:$0xff]  }
 0x3cf   : > { %v3998_v36 = vpop.f32.mrf.mxu0  ;;  %v4234_v56 = vld [vmem:[#allocation2 + $0x30] sm:$0xff]  }
 0x3d0   : > { %3632 = vst [vmem:[#allocation2 + $0x40] sm:$0xff] %v3558_v35   ;;  %v4292_v34 = vld [vmem:[#allocation4 + $0xf4] ss:$8 sps:$4 sm:$0xff]   ;;  %v4294_v35 = vld [vmem:[#allocation4 + $0xf0] ss:$8 sps:$4 sm:$0xff]  }
 0x3d1   : > { %v1858_v37 = vpop.f32.mrf.mxu0 }
 0x3d3   : > { %v3999_v38 = vpop.f32.mrf.mxu0 }
 0x3d4   : > { %v3573_v39 = vpack.c.bf16 %v3999_v38, %v3998_v36 }
 0x3d5   : > { %v1861_v40 = vpop.f32.mrf.mxu0  ;;  %v4243_v2 = vld [vmem:[#allocation2 + $0x48] sm:$0xff]  }
 0x3d6   : > { %3635 = vst [vmem:[#allocation2 + $0x58] sm:$0xff] %v3573_v39   ;;  %v3568_v41 = vpack.c.bf16 %v1861_v40, %v1858_v37  ;;  %v4782_v40 = vld [vmem:[%s5103_s5] ss:$0 sm:$0xff] }
 0x3d7   : > { %v4002_v42 = vpop.f32.mrf.mxu0  ;;  %v4245_v4 = vld [vmem:[#allocation2 + $0x40] sm:$0xff]  }
 0x3d8   : > { %3634 = vst [vmem:[#allocation2 + $0x50] sm:$0xff] %v3568_v41  }
 0x3d9   : > { %v1874_v43 = vpop.f32.mrf.mxu0 }
 0x3db   : > { %v4003_v44 = vpop.f32.mrf.mxu0 }
 0x3dc   : > { %v3583_v45 = vpack.c.bf16 %v4003_v44, %v4002_v42 }
 0x3dd   : > { %v1877_v46 = vpop.f32.mrf.mxu0  ;;  %v4239_v62 = vld [vmem:[#allocation2 + $0x58] sm:$0xff]  }
 0x3de   : > { %3637 = vst [vmem:[#allocation2 + $0x68] sm:$0xff] %v3583_v45   ;;  %v3578_v47 = vpack.c.bf16 %v1877_v46, %v1874_v43 }
 0x3df   : > { %v4006_v48 = vpop.f32.mrf.mxu0  ;;  %v4241_v0 = vld [vmem:[#allocation2 + $0x50] sm:$0xff]  }
 0x3e0   : > { %3636 = vst [vmem:[#allocation2 + $0x60] sm:$0xff] %v3578_v47  }
 0x3e1   : > { %v1890_v61 = vpop.f32.mrf.mxu0 }
 0x3e3   : > { %v4007_v49 = vpop.f32.mrf.mxu0 }
 0x3e4   : > { %v3593_v50 = vpack.c.bf16 %v4007_v49, %v4006_v48 }
 0x3e5   : > { %v1893_v51 = vpop.f32.mrf.mxu0  ;;  %v4235_v57 = vld [vmem:[#allocation2 + $0x68] sm:$0xff]  }
 0x3e6   : > { %3639 = vst [vmem:[#allocation2 + $0x78] sm:$0xff] %v3593_v50   ;;  %v3588_v52 = vpack.c.bf16 %v1893_v51, %v1890_v61 }
 0x3e7   : > { %v4237_v59 = vld [vmem:[#allocation2 + $0x60] sm:$0xff]  }
 0x3e8   : > { %3638 = vst [vmem:[#allocation2 + $0x70] sm:$0xff] %v3588_v52  }
 0x3ed   : > { %v4231_v53 = vld [vmem:[#allocation2 + $0x78] sm:$0xff]  }
 0x3ee   : > { %3800 = vmatprep.subr.bf16.mxu0 %v4231_v53  ;;  %4024 = vmatprep.subr.bf16.mxu1 %v4231_v53 }
 0x3ef   : > { %v4233_v55 = vld [vmem:[#allocation2 + $0x70] sm:$0xff]   ;;  %3801 = vmatpush3.bf16.msra.mxu0 %v4232_v54  ;;  %4032 = vmatpush3.bf16.msra.mxu1 %v4232_v54 }
 0x3f0   : > { %3802 = vmatprep.subr.bf16.mxu0 %v4233_v55  ;;  %4025 = vmatprep.subr.bf16.mxu1 %v4233_v55 }
 0x3f3   : > { %3803 = vmatpush3.bf16.msra.mxu0 %v4234_v56  ;;  %4033 = vmatpush3.bf16.msra.mxu1 %v4234_v56 }
 0x3f4   : > { %3804 = vmatprep.subr.bf16.mxu0 %v4235_v57  ;;  %4026 = vmatprep.subr.bf16.mxu1 %v4235_v57 }
 0x3f7   : > { %3805 = vmatpush3.bf16.msra.mxu0 %v4236_v58  ;;  %4034 = vmatpush3.bf16.msra.mxu1 %v4236_v58 }
 0x3f8   : > { %3806 = vmatprep.subr.bf16.mxu0 %v4237_v59  ;;  %4027 = vmatprep.subr.bf16.mxu1 %v4237_v59 }
 0x3fb   : > { %3807 = vmatpush3.bf16.msra.mxu0 %v4238_v60  ;;  %4035 = vmatpush3.bf16.msra.mxu1 %v4238_v60 }
 0x3fc   : > { %3808 = vmatprep.subr.bf16.mxu0 %v4239_v62  ;;  %4028 = vmatprep.subr.bf16.mxu1 %v4239_v62 }
 0x3ff   : > { %3809 = vmatpush3.bf16.msra.mxu0 %v4240_v63  ;;  %4036 = vmatpush3.bf16.msra.mxu1 %v4240_v63 }
 0x400   : > { %3810 = vmatprep.subr.bf16.mxu0 %v4241_v0  ;;  %4029 = vmatprep.subr.bf16.mxu1 %v4241_v0 }
 0x403   : > { %3811 = vmatpush3.bf16.msra.mxu0 %v4242_v1  ;;  %4037 = vmatpush3.bf16.msra.mxu1 %v4242_v1 }
 0x404   : > { %3812 = vmatprep.subr.bf16.mxu0 %v4243_v2  ;;  %4030 = vmatprep.subr.bf16.mxu1 %v4243_v2 }
 0x407   : > { %3813 = vmatpush3.bf16.msra.mxu0 %v4244_v3  ;;  %4038 = vmatpush3.bf16.msra.mxu1 %v4244_v3 }
 0x408   : > { %3814 = vmatprep.subr.bf16.mxu0 %v4245_v4  ;;  %4031 = vmatprep.subr.bf16.mxu1 %v4245_v4 }
 0x40b   : > { %3815 = vmatpush3.bf16.msra.mxu0 %v4246_v5  ;;  %4039 = vmatpush3.bf16.msra.mxu1 %v4246_v5 }
 0x40e   : > { %2425 = vmatmul.mubr.bf16.vlgmr.msra.gmra.mxu0 %v4247_v6  ;;  %2457 = vmatmul.mubr.bf16.vlgmr.msra.gmra.mxu1 %v4250_v7 }
 0x40f   : > { %2432 = vmatprep.mubr.bf16.mxu0 %v4253_v8  ;;  %2464 = vmatprep.mubr.bf16.mxu1 %v4255_v9 }
 0x416   : > { %2433 = vmatmul.mubr.bf16.gmra.mxu0 %v4257_v10  ;;  %2465 = vmatmul.mubr.bf16.gmra.mxu1 %v4258_v11 }
 0x417   : > { %2440 = vmatprep.mubr.bf16.mxu0 %v4259_v12  ;;  %2472 = vmatprep.mubr.bf16.mxu1 %v4261_v13 }
 0x41e   : > { %2441 = vmatmul.mubr.bf16.gmra.mxu0 %v4263_v14  ;;  %2473 = vmatmul.mubr.bf16.gmra.mxu1 %v4264_v15 }
 0x41f   : > { %2448 = vmatprep.mubr.bf16.mxu0 %v4265_v16  ;;  %2480 = vmatprep.mubr.bf16.mxu1 %v4267_v17 }
 0x426   : > { %2449 = vmatmul.mubr.bf16.gmra.mxu0 %v4269_v18  ;;  %2481 = vmatmul.mubr.bf16.gmra.mxu1 %v4270_v19 }
 0x427   : > { %2488 = vmatprep.mubr.bf16.mxu1 %v4271_v20 }
 0x42e   : > { %2489 = vmatmul.mubr.bf16.gmra.mxu1 %v4273_v21 }
 0x42f   : > { %2496 = vmatprep.mubr.bf16.mxu1 %v4274_v22 }
 0x436   : > { %2497 = vmatmul.mubr.bf16.gmra.mxu1 %v4276_v23 }
 0x437   : > { %2504 = vmatprep.mubr.bf16.mxu1 %v4277_v24 }
 0x43e   : > { %2505 = vmatmul.mubr.bf16.gmra.mxu1 %v4279_v25 }
 0x43f   : > { %2512 = vmatprep.mubr.bf16.mxu1 %v4280_v26 }
 0x446   : > { %2513 = vmatmul.mubr.bf16.gmra.mxu1 %v4282_v27 }
 0x447   : > { %2520 = vmatprep.mubr.bf16.mxu1 %v4283_v28 }
 0x44e   : > { %2521 = vmatmul.mubr.bf16.gmra.mxu1 %v4285_v29 }
 0x44f   : > { %2528 = vmatprep.mubr.bf16.mxu1 %v4286_v30 }
 0x456   : > { %2529 = vmatmul.mubr.bf16.gmra.mxu1 %v4288_v31 }
 0x457   : > { %2536 = vmatprep.mubr.bf16.mxu1 %v4289_v32 }
 0x45e   : > { %2537 = vmatmul.mubr.bf16.gmra.mxu1 %v4291_v33 }
 0x45f   : > { %2544 = vmatprep.mubr.bf16.mxu1 %v4292_v34 }
 0x466   : > { %2545 = vmatmul.mubr.bf16.gmra.mxu1 %v4294_v35 }
 0x4ce   : > { %v3816_v36 = vpop.f32.mrf.mxu0  ;;  %v3840_v37 = vpop.f32.mrf.mxu1 }
 0x4d0   : > { %v3817_v38 = vpop.f32.mrf.mxu0  ;;  %v3841_v39 = vpop.f32.mrf.mxu1 }
 0x4d1   : > { %v3818_v41 = vadd.f32 %v3817_v38, %v3816_v36  ;;  %v3842_v44 = vadd.f32 %v3841_v39, %v3840_v37 }
 0x4d2   : > { %v3819_v42 = vpop.f32.mrf.mxu0  ;;  %v3843_v43 = vpop.f32.mrf.mxu1 }
 0x4d3   : > { %v4785_v45 = vadd.f32 %v3818_v41, %v4782_v40  ;;  %v4792_v52 = vadd.f32 %v3842_v44, %v4782_v40 }
 0x4d4   : > { %v3820_v46 = vpop.f32.mrf.mxu0  ;;  %v3844_v47 = vpop.f32.mrf.mxu1 }
 0x4d5   : > { %v3821_v48 = vadd.f32 %v3820_v46, %v3819_v42  ;;  %v3845_v61 = vadd.f32 %v3844_v47, %v3843_v43  ;;  %2553 = vmax.xlane.f32.xlu0 %v4785_v45 }
 0x4d6   : > { %v3822_v49 = vpop.f32.mrf.mxu0  ;;  %v3846_v50 = vpop.f32.mrf.mxu1 }
 0x4d7   : > { %v4789_v51 = vadd.f32 %v3845_v61, %v4782_v40  ;;  %v4797_v56 = vadd.f32 %v3821_v48, %v4782_v40 }
 0x4d8   : > { %v3823_v53 = vpop.f32.mrf.mxu0  ;;  %v3847_v54 = vpop.f32.mrf.mxu1 }
 0x4d9   : > { %v3824_v55 = vadd.f32 %v3823_v53, %v3822_v49  ;;  %2571 = vmax.xlane.f32.xlu1 %v4789_v51  ;;  %2569 = vmax.xlane.f32.xlu0 %v4792_v52  ;;  %v3848_v59 = vadd.f32 %v3847_v54, %v3846_v50 }
 0x4da   : > { %v3825_v57 = vpop.f32.mrf.mxu0  ;;  %v3849_v58 = vpop.f32.mrf.mxu1 }
 0x4db   : > { %v4800_v60 = vadd.f32 %v3824_v55, %v4782_v40  ;;  %v4808_v5 = vadd.f32 %v3848_v59, %v4782_v40 }
 0x4dc   : > { %v3826_v62 = vpop.f32.mrf.mxu0  ;;  %v3850_v63 = vpop.f32.mrf.mxu1 }
 0x4dd   : > { %v3827_v0 = vadd.f32 %v3826_v62, %v3825_v57  ;;  %2557 = vmax.xlane.f32.xlu1 %v4800_v60  ;;  %2555 = vmax.xlane.f32.xlu0 %v4797_v56  ;;  %v3851_v3 = vadd.f32 %v3850_v63, %v3849_v58 }
 0x4de   : > { %v3828_v1 = vpop.f32.mrf.mxu0  ;;  %v3852_v2 = vpop.f32.mrf.mxu1 }
 0x4df   : > { %v4805_v4 = vadd.f32 %v3827_v0, %v4782_v40  ;;  %v4813_v12 = vadd.f32 %v3851_v3, %v4782_v40 }
 0x4e0   : > { %v3829_v6 = vpop.f32.mrf.mxu0  ;;  %v3853_v7 = vpop.f32.mrf.mxu1 }
 0x4e1   : > { %v3830_v8 = vadd.f32 %v3829_v6, %v3828_v1  ;;  %2559 = vmax.xlane.f32.xlu1 %v4805_v4  ;;  %2573 = vmax.xlane.f32.xlu0 %v4808_v5  ;;  %v3854_v11 = vadd.f32 %v3853_v7, %v3852_v2 }
 0x4e2   : > { %v3831_v9 = vpop.f32.mrf.mxu0  ;;  %v3855_v10 = vpop.f32.mrf.mxu1 }
 0x4e3   : > { %v4816_v13 = vadd.f32 %v3830_v8, %v4782_v40  ;;  %v4824_v21 = vadd.f32 %v3854_v11, %v4782_v40 }
 0x4e4   : > { %v3832_v14 = vpop.f32.mrf.mxu0  ;;  %v3856_v15 = vpop.f32.mrf.mxu1 }
 0x4e5   : > { %v3833_v16 = vadd.f32 %v3832_v14, %v3831_v9  ;;  %2575 = vmax.xlane.f32.xlu1 %v4813_v12  ;;  %2561 = vmax.xlane.f32.xlu0 %v4816_v13  ;;  %v3857_v19 = vadd.f32 %v3856_v15, %v3855_v10 }
 0x4e6   : > { %v3834_v17 = vpop.f32.mrf.mxu0  ;;  %v3858_v18 = vpop.f32.mrf.mxu1 }
 0x4e7   : > { %v4821_v20 = vadd.f32 %v3833_v16, %v4782_v40  ;;  %v4829_v28 = vadd.f32 %v3857_v19, %v4782_v40 }
 0x4e8   : > { %v3835_v22 = vpop.f32.mrf.mxu0  ;;  %v3859_v23 = vpop.f32.mrf.mxu1 }
 0x4e9   : > { %v3836_v24 = vadd.f32 %v3835_v22, %v3834_v17  ;;  %2563 = vmax.xlane.f32.xlu1 %v4821_v20  ;;  %2577 = vmax.xlane.f32.xlu0 %v4824_v21  ;;  %v3860_v27 = vadd.f32 %v3859_v23, %v3858_v18 }
 0x4ea   : > { %v3837_v25 = vpop.f32.mrf.mxu0  ;;  %v3861_v26 = vpop.f32.mrf.mxu1 }
 0x4eb   : > { %v4832_v29 = vadd.f32 %v3836_v24, %v4782_v40  ;;  %v4840_v36 = vadd.f32 %v3860_v27, %v4782_v40 }
 0x4ec   : > { %v3838_v30 = vpop.f32.mrf.mxu0  ;;  %v3862_v31 = vpop.f32.mrf.mxu1 }
 0x4ed   : > { %v3839_v32 = vadd.f32 %v3838_v30, %v3837_v25  ;;  %2579 = vmax.xlane.f32.xlu1 %v4829_v28  ;;  %2565 = vmax.xlane.f32.xlu0 %v4832_v29  ;;  %v3863_v34 = vadd.f32 %v3862_v31, %v3861_v26 }
 0x4ee   : > { %v3864_v33 = vpop.f32.mrf.mxu1 }
 0x4ef   : > { %v4837_v35 = vadd.f32 %v3839_v32, %v4782_v40  ;;  %v4845_v41 = vadd.f32 %v3863_v34, %v4782_v40 }
 0x4f0   : > { %v3865_v37 = vpop.f32.mrf.mxu1 }
 0x4f1   : > { %v3866_v38 = vadd.f32 %v3865_v37, %v3864_v33  ;;  %2567 = vmax.xlane.f32.xlu1 %v4837_v35  ;;  %2581 = vmax.xlane.f32.xlu0 %v4840_v36 }
 0x4f2   : > { %v3867_v39 = vpop.f32.mrf.mxu1 }
 0x4f3   : > { %v4848_v42 = vadd.f32 %v3866_v38, %v4782_v40 }
 0x4f4   : > { %v3868_v43 = vpop.f32.mrf.mxu1 }
 0x4f5   : > { %v3869_v44 = vadd.f32 %v3868_v43, %v3867_v39  ;;  %2583 = vmax.xlane.f32.xlu1 %v4845_v41  ;;  %2585 = vmax.xlane.f32.xlu0 %v4848_v42 }
 0x4f6   : > { %v3870_v46 = vpop.f32.mrf.mxu1 }
 0x4f7   : > { %v4853_v47 = vadd.f32 %v3869_v44, %v4782_v40 }
 0x4f8   : > { %v3871_v48 = vpop.f32.mrf.mxu1 }
 0x4f9   : > { %v3872_v61 = vadd.f32 %v3871_v48, %v3870_v46  ;;  %2587 = vmax.xlane.f32.xlu1 %v4853_v47 }
 0x4fa   : > { %v3873_v49 = vpop.f32.mrf.mxu1 }
 0x4fb   : > { %v4857_v50 = vadd.f32 %v3872_v61, %v4782_v40 }
 0x4fc   : > { %v3874_v53 = vpop.f32.mrf.mxu1 }
 0x4fd   : > { %v3875_v54 = vadd.f32 %v3874_v53, %v3873_v49  ;;  %2589 = vmax.xlane.f32.xlu0 %v4857_v50 }
 0x4fe   : > { %v3876_v55 = vpop.f32.mrf.mxu1 }
 0x4ff   : > { %v4861_v57 = vadd.f32 %v3875_v54, %v4782_v40 }
 0x500   : > { %v3877_v58 = vpop.f32.mrf.mxu1 }
 0x501   : > { %v3878_v59 = vadd.f32 %v3877_v58, %v3876_v55  ;;  %2591 = vmax.xlane.f32.xlu1 %v4861_v57 }
 0x502   : > { %v3879_v62 = vpop.f32.mrf.mxu1 }
 0x503   : > { %v4865_v63 = vadd.f32 %v3878_v59, %v4782_v40 }
 0x504   : > { %v3880_v0 = vpop.f32.mrf.mxu1 }
 0x505   : > { %v3881_v1 = vadd.f32 %v3880_v0, %v3879_v62  ;;  %2593 = vmax.xlane.f32.xlu0 %v4865_v63 }
 0x506   : > { %v3882_v2 = vpop.f32.mrf.mxu1 }
 0x507   : > { %v4869_v3 = vadd.f32 %v3881_v1, %v4782_v40 }
 0x508   : > { %v3883_v6 = vpop.f32.mrf.mxu1 }
 0x509   : > { %v3884_v7 = vadd.f32 %v3883_v6, %v3882_v2  ;;  %2595 = vmax.xlane.f32.xlu1 %v4869_v3 }
 0x50a   : > { %v3885_v8 = vpop.f32.mrf.mxu1 }
 0x50b   : > { %v4873_v9 = vadd.f32 %v3884_v7, %v4782_v40 }
 0x50c   : > { %v3886_v10 = vpop.f32.mrf.mxu1 }
 0x50d   : > { %v3887_v11 = vadd.f32 %v3886_v10, %v3885_v8  ;;  %2597 = vmax.xlane.f32.xlu0 %v4873_v9 }
 0x50e   : > { %v3888_v14 = vpop.f32.mrf.mxu1 }
 0x50f   : > { %v4877_v15 = vadd.f32 %v3887_v11, %v4782_v40 }
 0x510   : > { %v3889_v16 = vpop.f32.mrf.mxu1 }
 0x511   : > { %v3890_v17 = vadd.f32 %v3889_v16, %v3888_v14  ;;  %2599 = vmax.xlane.f32.xlu1 %v4877_v15 }
 0x512   : > { %v3891_v18 = vpop.f32.mrf.mxu1 }
 0x513   : > { %v4881_v19 = vadd.f32 %v3890_v17, %v4782_v40 }
 0x514   : > { %v3892_v22 = vpop.f32.mrf.mxu1 }
 0x515   : > { %v3893_v23 = vadd.f32 %v3892_v22, %v3891_v18  ;;  %2601 = vmax.xlane.f32.xlu0 %v4881_v19 }
 0x516   : > { %v3894_v24 = vpop.f32.mrf.mxu1 }
 0x517   : > { %v4885_v25 = vadd.f32 %v3893_v23, %v4782_v40 }
 0x518   : > { %v3895_v26 = vpop.f32.mrf.mxu1 }
 0x519   : > { %v3896_v27 = vadd.f32 %v3895_v26, %v3894_v24  ;;  %2603 = vmax.xlane.f32.xlu1 %v4885_v25 }
 0x51a   : > { %v3897_v30 = vpop.f32.mrf.mxu1 }
 0x51b   : > { %v4889_v31 = vadd.f32 %v3896_v27, %v4782_v40 }
 0x51c   : > { %v3898_v32 = vpop.f32.mrf.mxu1 }
 0x51d   : > { %v3899_v33 = vadd.f32 %v3898_v32, %v3897_v30  ;;  %2605 = vmax.xlane.f32.xlu0 %v4889_v31 }
 0x51e   : > { %v3900_v34 = vpop.f32.mrf.mxu1 }
 0x51f   : > { %v4893_v37 = vadd.f32 %v3899_v33, %v4782_v40 }
 0x520   : > { %v3901_v38 = vpop.f32.mrf.mxu1 }
 0x521   : > { %v3902_v39 = vadd.f32 %v3901_v38, %v3900_v34  ;;  %2607 = vmax.xlane.f32.xlu1 %v4893_v37 }
 0x522   : > { %v3903_v43 = vpop.f32.mrf.mxu1 }
 0x523   : > { %v4897_v44 = vadd.f32 %v3902_v39, %v4782_v40 }
 0x524   : > { %v3904_v46 = vpop.f32.mrf.mxu1 }
 0x525   : > { %v3905_v48 = vadd.f32 %v3904_v46, %v3903_v43  ;;  %2609 = vmax.xlane.f32.xlu0 %v4897_v44 }
 0x526   : > { %v3906_v61 = vpop.f32.mrf.mxu1 }
 0x527   : > { %v4901_v49 = vadd.f32 %v3905_v48, %v4782_v40 }
 0x528   : > { %v3907_v53 = vpop.f32.mrf.mxu1 }
 0x529   : > { %v3908_v54 = vadd.f32 %v3907_v53, %v3906_v61  ;;  %2611 = vmax.xlane.f32.xlu1 %v4901_v49 }
 0x52a   : > { %v3909_v55 = vpop.f32.mrf.mxu1 }
 0x52b   : > { %v4905_v58 = vadd.f32 %v3908_v54, %v4782_v40 }
 0x52c   : > { %v3910_v59 = vpop.f32.mrf.mxu1 }
 0x52d   : > { %v3911_v62 = vadd.f32 %v3910_v59, %v3909_v55  ;;  %2613 = vmax.xlane.f32.xlu0 %v4905_v58 }
 0x52f   : > { %v4909_v0 = vadd.f32 %v3911_v62, %v4782_v40 }
 0x531   : > { %2615 = vmax.xlane.f32.xlu1 %v4909_v0 }
 0x55e   : > { %v2554_v1 = vpop.xlane.xlu0 %2553 }
 0x55f   : > { %v4913_v2 = vsub.f32 %v4785_v45, %v2554_v1 }
 0x561   : > { %v2649_v6 = vmul.f32 1.442695, %v4913_v2 }
 0x562   : > { %v2572_v7 = vpop.xlane.xlu1 %2571  ;;  %v2570_v8 = vpop.xlane.xlu0 %2569 }
 0x563   : > { %4295 = vpow2.f32 %v2649_v6  ;;  %v4917_v10 = vsub.f32 %v4792_v52, %v2570_v8  ;;  %v4921_v40 = vsub.f32 %v4789_v51, %v2572_v7 }
 0x565   : > { %v2665_v11 = vmul.f32 1.442695, %v4917_v10  ;;  %v2667_v24 = vmul.f32 1.442695, %v4921_v40 }
 0x566   : > { %v2558_v14 = vpop.xlane.xlu1 %2557  ;;  %v2556_v16 = vpop.xlane.xlu0 %2555 }
 0x567   : > { %v4924_v17 = vsub.f32 %v4800_v60, %v2558_v14  ;;  %v4927_v45 = vsub.f32 %v4797_v56, %v2556_v16  ;;  %4297 = vpow2.f32 %v2665_v11 }
 0x569   : > { %v2653_v18 = vmul.f32 1.442695, %v4924_v17  ;;  %v2651_v22 = vmul.f32 1.442695, %v4927_v45 }
 0x56a   : > { %v2560_v52 = vpop.xlane.xlu1 %2559  ;;  %v2574_v23 = vpop.xlane.xlu0 %2573 }
 0x56b   : > { %4299 = vpow2.f32 %v2653_v18  ;;  %v4933_v26 = vsub.f32 %v4805_v4, %v2560_v52  ;;  %v4936_v51 = vsub.f32 %v4808_v5, %v2574_v23 }
 0x56c   : > { %4301 = vpow2.f32 %v2651_v22 }
 0x56d   : > { %v2669_v56 = vmul.f32 1.442695, %v4936_v51  ;;  %4303 = vpow2.f32 %v2667_v24  ;;  %v2655_v30 = vmul.f32 1.442695, %v4933_v26 }
 0x56e   : > { %v2576_v60 = vpop.xlane.xlu1 %2575  ;;  %v2562_v27 = vpop.xlane.xlu0 %2561 }
 0x56f   : > { %v4941_v32 = vsub.f32 %v4813_v12, %v2576_v60  ;;  %v4944_v33 = vsub.f32 %v4816_v13, %v2562_v27  ;;  %4305 = vpow2.f32 %v2669_v56 }
 0x570   : > { %v4296_v34 = vpop.eup %4295  ;;  %4307 = vpow2.f32 %v2655_v30 }
 0x571   : > { %v2657_v4 = vmul.f32 1.442695, %v4944_v33  ;;  %2713 = vadd.xlane.f32.xlu0 %v4296_v34  ;;  %v2671_v39 = vmul.f32 1.442695, %v4941_v32 }
 0x572   : > { %v2564_v5 = vpop.xlane.xlu1 %2563  ;;  %v2578_v38 = vpop.xlane.xlu0 %2577 }
 0x573   : > { %v4949_v43 = vsub.f32 %v4821_v20, %v2564_v5  ;;  %v4952_v46 = vsub.f32 %v4824_v21, %v2578_v38  ;;  %4309 = vpow2.f32 %v2657_v4 }
 0x574   : > { %v4298_v12 = vpop.eup %4297  ;;  %4311 = vpow2.f32 %v2671_v39 }
 0x575   : > { %v2673_v13 = vmul.f32 1.442695, %v4952_v46  ;;  %2729 = vadd.xlane.f32.xlu0 %v4298_v12  ;;  %v2659_v53 = vmul.f32 1.442695, %v4949_v43 }
 0x576   : > { %v2580_v48 = vpop.xlane.xlu1 %2579  ;;  %v2566_v61 = vpop.xlane.xlu0 %2565 }
 0x577   : > { %v4957_v54 = vsub.f32 %v4829_v28, %v2580_v48  ;;  %v4960_v55 = vsub.f32 %v4832_v29, %v2566_v61  ;;  %4313 = vpow2.f32 %v2673_v13 }
 0x578   : > { %v4300_v20 = vpop.eup %4299  ;;  %4315 = vpow2.f32 %v2659_v53 }
 0x579   : > { %v4302_v21 = vpop.eup %4301  ;;  %v2661_v59 = vmul.f32 1.442695, %v4960_v55  ;;  %2717 = vadd.xlane.f32.xlu0 %v4300_v20  ;;  %v2675_v6 = vmul.f32 1.442695, %v4957_v54 }
 0x57a   : > { %2715 = vadd.xlane.f32.xlu1 %v4302_v21  ;;  %v2568_v62 = vpop.xlane.xlu1 %2567  ;;  %v2582_v1 = vpop.xlane.xlu0 %2581 }
 0x57b   : > { %v4965_v7 = vsub.f32 %v4837_v35, %v2568_v62  ;;  %v4968_v28 = vsub.f32 %v4840_v36, %v2582_v1  ;;  %v4304_v29 = vpop.eup %4303  ;;  %4317 = vpow2.f32 %v2661_v59 }
 0x57c   : > { %v4306_v8 = vpop.eup %4305  ;;  %4319 = vpow2.f32 %v2675_v6 }
 0x57d   : > { %v2677_v11 = vmul.f32 1.442695, %v4968_v28  ;;  %2733 = vadd.xlane.f32.xlu0 %v4306_v8  ;;  %v2663_v18 = vmul.f32 1.442695, %v4965_v7  ;;  %v4308_v35 = vpop.eup %4307 }
 0x57e   : > { %2731 = vadd.xlane.f32.xlu1 %v4304_v29  ;;  %v2584_v14 = vpop.xlane.xlu1 %2583  ;;  %v2586_v16 = vpop.xlane.xlu0 %2585 }
 0x57f   : > { %v4973_v22 = vsub.f32 %v4848_v42, %v2586_v16  ;;  %4321 = vpow2.f32 %v2677_v11  ;;  %v4976_v36 = vsub.f32 %v4845_v41, %v2584_v14 }
 0x580   : > { %v4310_v52 = vpop.eup %4309  ;;  %4323 = vpow2.f32 %v2663_v18 }
 0x581   : > { %v2681_v23 = vmul.f32 1.442695, %v4973_v22  ;;  %2721 = vadd.xlane.f32.xlu0 %v4310_v52  ;;  %v4312_v56 = vpop.eup %4311  ;;  %v2679_v60 = vmul.f32 1.442695, %v4976_v36 }
 0x582   : > { %2719 = vadd.xlane.f32.xlu1 %v4308_v35  ;;  %v2588_v24 = vpop.xlane.xlu1 %2587 }
 0x583   : > { %4325 = vpow2.f32 %v2681_v23  ;;  %v4981_v27 = vsub.f32 %v4853_v47, %v2588_v24 }
 0x584   : > { %v4314_v42 = vpop.eup %4313  ;;  %4327 = vpow2.f32 %v2679_v60 }
 0x585   : > { %2737 = vadd.xlane.f32.xlu0 %v4314_v42  ;;  %v4316_v34 = vpop.eup %4315  ;;  %v2683_v4 = vmul.f32 1.442695, %v4981_v27 }
 0x586   : > { %2735 = vadd.xlane.f32.xlu1 %v4312_v56  ;;  %v2590_v30 = vpop.xlane.xlu0 %2589 }
 0x587   : > { %v4984_v41 = vsub.f32 %v4857_v50, %v2590_v30 }
 0x588   : > { %v4318_v5 = vpop.eup %4317 }
 0x589   : > { %v2685_v38 = vmul.f32 1.442695, %v4984_v41  ;;  %2725 = vadd.xlane.f32.xlu0 %v4318_v5  ;;  %v4320_v12 = vpop.eup %4319 }
 0x58a   : > { %2723 = vadd.xlane.f32.xlu1 %v4316_v34  ;;  %v2592_v39 = vpop.xlane.xlu1 %2591 }
 0x58b   : > { %4329 = vpow2.f32 %v2685_v38  ;;  %v4989_v47 = vsub.f32 %v4861_v57, %v2592_v39 }
 0x58c   : > { %4331 = vpow2.f32 %v2683_v4  ;;  %v4322_v13 = vpop.eup %4321 }
 0x58d   : > { %v2687_v50 = vmul.f32 1.442695, %v4989_v47  ;;  %2741 = vadd.xlane.f32.xlu0 %v4322_v13  ;;  %v4324_v53 = vpop.eup %4323 }
 0x58e   : > { %2739 = vadd.xlane.f32.xlu1 %v4320_v12  ;;  %v2594_v48 = vpop.xlane.xlu0 %2593 }
 0x58f   : > { %4333 = vpow2.f32 %v2687_v50  ;;  %v4993_v61 = vsub.f32 %v4865_v63, %v2594_v48 }
 0x590   : > { %v4326_v20 = vpop.eup %4325 }
 0x591   : > { %v2689_v21 = vmul.f32 1.442695, %v4993_v61  ;;  %2745 = vadd.xlane.f32.xlu0 %v4326_v20  ;;  %v4328_v62 = vpop.eup %4327 }
 0x592   : > { %2727 = vadd.xlane.f32.xlu1 %v4324_v53  ;;  %v2596_v57 = vpop.xlane.xlu1 %2595 }
 0x593   : > { %4335 = vpow2.f32 %v2689_v21  ;;  %v4997_v59 = vsub.f32 %v4869_v3, %v2596_v57 }
 0x595   : > { %v2691_v1 = vmul.f32 1.442695, %v4997_v59 }
 0x596   : > { %2743 = vadd.xlane.f32.xlu1 %v4328_v62  ;;  %v2598_v6 = vpop.xlane.xlu0 %2597 }
 0x597   : > { %4337 = vpow2.f32 %v2691_v1  ;;  %v5001_v63 = vsub.f32 %v4873_v9, %v2598_v6 }
 0x598   : > { %v4330_v29 = vpop.eup %4329 }
 0x599   : > { %v4332_v8 = vpop.eup %4331  ;;  %v2693_v11 = vmul.f32 1.442695, %v5001_v63  ;;  %2749 = vadd.xlane.f32.xlu0 %v4330_v29 }
 0x59a   : > { %2747 = vadd.xlane.f32.xlu1 %v4332_v8  ;;  %v2600_v14 = vpop.xlane.xlu1 %2599 }
 0x59b   : > { %4339 = vpow2.f32 %v2693_v11  ;;  %v5005_v3 = vsub.f32 %v4877_v15, %v2600_v14 }
 0x59c   : > { %v4334_v16 = vpop.eup %4333 }
 0x59d   : > { %v2695_v18 = vmul.f32 1.442695, %v5005_v3 }
 0x59e   : > { %2751 = vadd.xlane.f32.xlu1 %v4334_v16  ;;  %v2602_v35 = vpop.xlane.xlu0 %2601 }
 0x59f   : > { %4341 = vpow2.f32 %v2695_v18  ;;  %v5009_v9 = vsub.f32 %v4881_v19, %v2602_v35 }
 0x5a0   : > { %v4336_v52 = vpop.eup %4335 }
 0x5a1   : > { %v2697_v23 = vmul.f32 1.442695, %v5009_v9  ;;  %2753 = vadd.xlane.f32.xlu0 %v4336_v52 }
 0x5a2   : > { %v2604_v24 = vpop.xlane.xlu1 %2603 }
 0x5a3   : > { %4343 = vpow2.f32 %v2697_v23  ;;  %v5013_v56 = vsub.f32 %v4885_v25, %v2604_v24 }
 0x5a4   : > { %v4338_v15 = vpop.eup %4337 }
 0x5a5   : > { %v2699_v60 = vmul.f32 1.442695, %v5013_v56  ;;  %2755 = vadd.xlane.f32.xlu1 %v4338_v15 }
 0x5a6   : > { %v2606_v42 = vpop.xlane.xlu0 %2605 }
 0x5a7   : > { %4345 = vpow2.f32 %v2699_v60  ;;  %v5017_v30 = vsub.f32 %v4889_v31, %v2606_v42 }
 0x5a8   : > { %v4340_v19 = vpop.eup %4339 }
 0x5a9   : > { %v2701_v34 = vmul.f32 1.442695, %v5017_v30  ;;  %2757 = vadd.xlane.f32.xlu0 %v4340_v19 }
 0x5aa   : > { %v2608_v4 = vpop.xlane.xlu1 %2607 }
 0x5ab   : > { %4347 = vpow2.f32 %v2701_v34  ;;  %v5021_v5 = vsub.f32 %v4893_v37, %v2608_v4 }
 0x5ac   : > { %v4342_v25 = vpop.eup %4341 }
 0x5ad   : > { %v2703_v38 = vmul.f32 1.442695, %v5021_v5  ;;  %2759 = vadd.xlane.f32.xlu1 %v4342_v25 }
 0x5ae   : > { %v2610_v39 = vpop.xlane.xlu0 %2609 }
 0x5af   : > { %4349 = vpow2.f32 %v2703_v38  ;;  %v5025_v12 = vsub.f32 %v4897_v44, %v2610_v39 }
 0x5b0   : > { %v4344_v31 = vpop.eup %4343 }
 0x5b1   : > { %v2705_v13 = vmul.f32 1.442695, %v5025_v12  ;;  %2761 = vadd.xlane.f32.xlu0 %v4344_v31 }
 0x5b2   : > { %v2612_v50 = vpop.xlane.xlu1 %2611 }
 0x5b3   : > { %4351 = vpow2.f32 %v2705_v13  ;;  %v5029_v48 = vsub.f32 %v4901_v49, %v2612_v50 }
 0x5b4   : > { %v4346_v37 = vpop.eup %4345 }
 0x5b5   : > { %v2707_v53 = vmul.f32 1.442695, %v5029_v48  ;;  %2763 = vadd.xlane.f32.xlu1 %v4346_v37 }
 0x5b6   : > { %v2614_v20 = vpop.xlane.xlu0 %2613 }
 0x5b7   : > { %4353 = vpow2.f32 %v2707_v53  ;;  %v5033_v21 = vsub.f32 %v4905_v58, %v2614_v20 }
 0x5b8   : > { %v4348_v44 = vpop.eup %4347 }
 0x5b9   : > { %v2709_v57 = vmul.f32 1.442695, %v5033_v21  ;;  %2765 = vadd.xlane.f32.xlu0 %v4348_v44 }
 0x5ba   : > { %v2616_v62 = vpop.xlane.xlu1 %2615 }
 0x5bb   : > { %4355 = vpow2.f32 %v2709_v57  ;;  %v5037_v1 = vsub.f32 %v4909_v0, %v2616_v62 }
 0x5bc   : > { %v4350_v49 = vpop.eup %4349 }
 0x5bd   : > { %v2711_v6 = vmul.f32 1.442695, %v5037_v1  ;;  %2767 = vadd.xlane.f32.xlu1 %v4350_v49 }
 0x5bf   : > { %4357 = vpow2.f32 %v2711_v6 }
 0x5c0   : > { %v4352_v29 = vpop.eup %4351 }
 0x5c1   : > { %2769 = vadd.xlane.f32.xlu0 %v4352_v29 }
 0x5c4   : > { %v4354_v8 = vpop.eup %4353 }
 0x5c5   : > { %2771 = vadd.xlane.f32.xlu1 %v4354_v8 }
 0x5c8   : > { %v4356_v58 = vpop.eup %4355 }
 0x5c9   : > { %2773 = vadd.xlane.f32.xlu0 %v4356_v58 }
 0x5cc   : > { %v4358_v11 = vpop.eup %4357 }
 0x5cd   : > { %2775 = vadd.xlane.f32.xlu1 %v4358_v11 }
 0x5fa   : > { %v2714_v14 = vpop.xlane.xlu0 %2713 }
 0x5fb   : > { %4359 = vlog2.f32 %v2714_v14 }
 0x5fe   : > { %v2730_v16 = vpop.xlane.xlu0 %2729 }
 0x5ff   : > { %4361 = vlog2.f32 %v2730_v16 }
 0x602   : > { %v2718_v0 = vpop.xlane.xlu0 %2717 }
 0x603   : > { %v2716_v18 = vpop.xlane.xlu1 %2715 }
 0x604   : > { %4363 = vlog2.f32 %v2716_v18 }
 0x605   : > { %4365 = vlog2.f32 %v2718_v0 }
 0x606   : > { %v2734_v52 = vpop.xlane.xlu0 %2733 }
 0x607   : > { %v2732_v35 = vpop.xlane.xlu1 %2731 }
 0x608   : > { %v4360_v23 = vpop.eup %4359  ;;  %4367 = vlog2.f32 %v2732_v35 }
 0x609   : > { %v2778_v24 = vmul.f32 0.6931472, %v4360_v23  ;;  %4369 = vlog2.f32 %v2734_v52 }
 0x60a   : > { %v2722_v42 = vpop.xlane.xlu0 %2721 }
 0x60b   : > { %v2841_v15 = vsub.f32 %v4913_v2, %v2778_v24  ;;  %v2720_v60 = vpop.xlane.xlu1 %2719 }
 0x60c   : > { %4371 = vlog2.f32 %v2720_v60  ;;  %v4362_v19 = vpop.eup %4361 }
 0x60d   : > { %2873 = vst [vmem:[#allocation12] sm:$0xff] %v2841_v15  ;;  %4373 = vlog2.f32 %v2722_v42  ;;  %v2794_v34 = vmul.f32 0.6931472, %v4362_v19 }
 0x60e   : > { %v2738_v25 = vpop.xlane.xlu0 %2737 }
 0x60f   : > { %v2736_v4 = vpop.xlane.xlu1 %2735  ;;  %v2849_v38 = vsub.f32 %v4917_v10, %v2794_v34 }
 0x610   : > { %4375 = vlog2.f32 %v2736_v4 }
 0x611   : > { %v4364_v39 = vpop.eup %4363  ;;  %4377 = vlog2.f32 %v2738_v25  ;;  %2881 = vst [vmem:[#allocation12 + $0x40] sm:$0xff] %v2849_v38 }
 0x612   : > { %v4366_v31 = vpop.eup %4365  ;;  %v2780_v13 = vmul.f32 0.6931472, %v4364_v39  ;;  %v2726_v2 = vpop.xlane.xlu0 %2725 }
 0x613   : > { %v2782_v50 = vmul.f32 0.6931472, %v4366_v31  ;;  %v2724_v37 = vpop.xlane.xlu1 %2723 }
 0x614   : > { %v2842_v53 = vsub.f32 %v4927_v45, %v2780_v13  ;;  %4379 = vlog2.f32 %v2724_v37 }
 0x615   : > { %v4368_v20 = vpop.eup %4367  ;;  %v2843_v44 = vsub.f32 %v4924_v17, %v2782_v50  ;;  %4381 = vlog2.f32 %v2726_v2 }
 0x616   : > { %v4370_v57 = vpop.eup %4369  ;;  %2874 = vst [vmem:[#allocation12 + $0x8] sm:$0xff] %v2842_v53  ;;  %v2796_v62 = vmul.f32 0.6931472, %v4368_v20  ;;  %v2742_v6 = vpop.xlane.xlu0 %2741 }
 0x617   : > { %2875 = vst [vmem:[#allocation12 + $0x10] sm:$0xff] %v2843_v44  ;;  %v2798_v10 = vmul.f32 0.6931472, %v4370_v57  ;;  %v2740_v49 = vpop.xlane.xlu1 %2739 }
 0x618   : > { %v2850_v29 = vsub.f32 %v4921_v40, %v2796_v62  ;;  %4383 = vlog2.f32 %v2740_v49 }
 0x619   : > { %v4372_v8 = vpop.eup %4371  ;;  %v2851_v58 = vsub.f32 %v4936_v51, %v2798_v10  ;;  %4385 = vlog2.f32 %v2742_v6 }
 0x61a   : > { %v4374_v45 = vpop.eup %4373  ;;  %2882 = vst [vmem:[#allocation12 + $0x48] sm:$0xff] %v2850_v29  ;;  %v2784_v11 = vmul.f32 0.6931472, %v4372_v8  ;;  %v2746_v16 = vpop.xlane.xlu0 %2745 }
 0x61b   : > { %2883 = vst [vmem:[#allocation12 + $0x50] sm:$0xff] %v2851_v58  ;;  %v2786_v17 = vmul.f32 0.6931472, %v4374_v45  ;;  %v2728_v14 = vpop.xlane.xlu1 %2727 }
 0x61c   : > { %v2844_v18 = vsub.f32 %v4933_v26, %v2784_v11  ;;  %4387 = vlog2.f32 %v2728_v14 }
 0x61d   : > { %v4376_v0 = vpop.eup %4375  ;;  %v2845_v35 = vsub.f32 %v4944_v33, %v2786_v17  ;;  %4389 = vlog2.f32 %v2746_v16 }
 0x61e   : > { %v4378_v40 = vpop.eup %4377  ;;  %2876 = vst [vmem:[#allocation12 + $0x18] sm:$0xff] %v2844_v18  ;;  %v2800_v52 = vmul.f32 0.6931472, %v4376_v0 }
 0x61f   : > { %2877 = vst [vmem:[#allocation12 + $0x20] sm:$0xff] %v2845_v35  ;;  %v2802_v51 = vmul.f32 0.6931472, %v4378_v40  ;;  %v2744_v23 = vpop.xlane.xlu1 %2743 }
 0x620   : > { %v2852_v24 = vsub.f32 %v4941_v32, %v2800_v52  ;;  %4391 = vlog2.f32 %v2744_v23 }
 0x621   : > { %v4380_v15 = vpop.eup %4379  ;;  %v2853_v60 = vsub.f32 %v4952_v46, %v2802_v51 }
 0x622   : > { %v4382_v42 = vpop.eup %4381  ;;  %2884 = vst [vmem:[#allocation12 + $0x58] sm:$0xff] %v2852_v24  ;;  %v2788_v26 = vmul.f32 0.6931472, %v4380_v15  ;;  %v2750_v19 = vpop.xlane.xlu0 %2749 }
 0x623   : > { %2885 = vst [vmem:[#allocation12 + $0x60] sm:$0xff] %v2853_v60  ;;  %v2790_v34 = vmul.f32 0.6931472, %v4382_v42  ;;  %v2748_v33 = vpop.xlane.xlu1 %2747  ;;  %4393 = vlog2.f32 %v2750_v19 }
 0x624   : > { %v2846_v4 = vsub.f32 %v4949_v43, %v2788_v26  ;;  %4395 = vlog2.f32 %v2748_v33 }
 0x625   : > { %v4384_v25 = vpop.eup %4383  ;;  %v2847_v38 = vsub.f32 %v4960_v55, %v2790_v34 }
 0x626   : > { %v4386_v39 = vpop.eup %4385  ;;  %2878 = vst [vmem:[#allocation12 + $0x28] sm:$0xff] %v2846_v4  ;;  %v2804_v32 = vmul.f32 0.6931472, %v4384_v25 }
 0x627   : > { %2879 = vst [vmem:[#allocation12 + $0x30] sm:$0xff] %v2847_v38  ;;  %v2806_v31 = vmul.f32 0.6931472, %v4386_v39  ;;  %v2752_v46 = vpop.xlane.xlu1 %2751 }
 0x628   : > { %v2854_v13 = vsub.f32 %v4957_v54, %v2804_v32  ;;  %4397 = vlog2.f32 %v2752_v46 }
 0x629   : > { %v4388_v50 = vpop.eup %4387  ;;  %v2855_v37 = vsub.f32 %v4968_v28, %v2806_v31 }
 0x62a   : > { %v4390_v2 = vpop.eup %4389  ;;  %2886 = vst [vmem:[#allocation12 + $0x68] sm:$0xff] %v2854_v13  ;;  %v2792_v53 = vmul.f32 0.6931472, %v4388_v50  ;;  %v2754_v43 = vpop.xlane.xlu0 %2753 }
 0x62b   : > { %2887 = vst [vmem:[#allocation12 + $0x70] sm:$0xff] %v2855_v37  ;;  %v2810_v20 = vmul.f32 0.6931472, %v4390_v2  ;;  %4399 = vlog2.f32 %v2754_v43 }
 0x62c   : > { %v2848_v55 = vsub.f32 %v4965_v7, %v2792_v53 }
 0x62d   : > { %v4392_v44 = vpop.eup %4391  ;;  %v2857_v57 = vsub.f32 %v4973_v22, %v2810_v20 }
 0x62e   : > { %2880 = vst [vmem:[#allocation12 + $0x38] sm:$0xff] %v2848_v55  ;;  %v2808_v62 = vmul.f32 0.6931472, %v4392_v44  ;;  %v2756_v10 = vpop.xlane.xlu1 %2755 }
 0x62f   : > { %2889 = vst [vmem:[#allocation12 + $0x80] sm:$0xff] %v2857_v57  ;;  %4401 = vlog2.f32 %v2756_v10 }
 0x630   : > { %v4394_v54 = vpop.eup %4393  ;;  %v2856_v28 = vsub.f32 %v4976_v36, %v2808_v62 }
 0x631   : > { %v4396_v49 = vpop.eup %4395  ;;  %v2814_v6 = vmul.f32 0.6931472, %v4394_v54 }
 0x632   : > { %2888 = vst [vmem:[#allocation12 + $0x78] sm:$0xff] %v2856_v28  ;;  %v2812_v29 = vmul.f32 0.6931472, %v4396_v49  ;;  %v2758_v8 = vpop.xlane.xlu0 %2757 }
 0x633   : > { %v2859_v58 = vsub.f32 %v4984_v41, %v2814_v6  ;;  %4403 = vlog2.f32 %v2758_v8 }
 0x634   : > { %v2858_v7 = vsub.f32 %v4981_v27, %v2812_v29 }
 0x635   : > { %v4398_v45 = vpop.eup %4397  ;;  %2891 = vst [vmem:[#allocation12 + $0x90] sm:$0xff] %v2859_v58 }
 0x636   : > { %2890 = vst [vmem:[#allocation12 + $0x88] sm:$0xff] %v2858_v7  ;;  %v2816_v22 = vmul.f32 0.6931472, %v4398_v45  ;;  %v2760_v11 = vpop.xlane.xlu1 %2759 }
 0x637   : > { %4405 = vlog2.f32 %v2760_v11 }
 0x638   : > { %v4400_v17 = vpop.eup %4399  ;;  %v2860_v14 = vsub.f32 %v4989_v47, %v2816_v22 }
 0x639   : > { %v2818_v36 = vmul.f32 0.6931472, %v4400_v17 }
 0x63a   : > { %2892 = vst [vmem:[#allocation12 + $0x98] sm:$0xff] %v2860_v14  ;;  %v2762_v16 = vpop.xlane.xlu0 %2761 }
 0x63b   : > { %v2861_v18 = vsub.f32 %v4993_v61, %v2818_v36  ;;  %4407 = vlog2.f32 %v2762_v16 }
 0x63c   : > { %v4402_v0 = vpop.eup %4401 }
 0x63d   : > { %2893 = vst [vmem:[#allocation12 + $0xa0] sm:$0xff] %v2861_v18  ;;  %v2820_v41 = vmul.f32 0.6931472, %v4402_v0 }
 0x63e   : > { %v2764_v35 = vpop.xlane.xlu1 %2763 }
 0x63f   : > { %v2862_v27 = vsub.f32 %v4997_v59, %v2820_v41  ;;  %4409 = vlog2.f32 %v2764_v35 }
 0x640   : > { %v4404_v40 = vpop.eup %4403 }
 0x641   : > { %2894 = vst [vmem:[#allocation12 + $0xa8] sm:$0xff] %v2862_v27  ;;  %v2822_v52 = vmul.f32 0.6931472, %v4404_v40 }
 0x642   : > { %v2766_v51 = vpop.xlane.xlu0 %2765 }
 0x643   : > { %v2863_v23 = vsub.f32 %v5001_v63, %v2822_v52  ;;  %4411 = vlog2.f32 %v2766_v51 }
 0x644   : > { %v4406_v47 = vpop.eup %4405 }
 0x645   : > { %2895 = vst [vmem:[#allocation12 + $0xb0] sm:$0xff] %v2863_v23  ;;  %v2824_v24 = vmul.f32 0.6931472, %v4406_v47 }
 0x646   : > { %v2768_v15 = vpop.xlane.xlu1 %2767 }
 0x647   : > { %v2864_v61 = vsub.f32 %v5005_v3, %v2824_v24  ;;  %4413 = vlog2.f32 %v2768_v15 }
 0x648   : > { %v4408_v60 = vpop.eup %4407 }
 0x649   : > { %2896 = vst [vmem:[#allocation12 + $0xb8] sm:$0xff] %v2864_v61  ;;  %v2826_v42 = vmul.f32 0.6931472, %v4408_v60 }
 0x64a   : > { %v2770_v26 = vpop.xlane.xlu0 %2769 }
 0x64b   : > { %v2865_v59 = vsub.f32 %v5009_v9, %v2826_v42  ;;  %4415 = vlog2.f32 %v2770_v26 }
 0x64c   : > { %v4410_v19 = vpop.eup %4409 }
 0x64d   : > { %2897 = vst [vmem:[#allocation12 + $0xc0] sm:$0xff] %v2865_v59  ;;  %v2828_v34 = vmul.f32 0.6931472, %v4410_v19 }
 0x64e   : > { %v2772_v33 = vpop.xlane.xlu1 %2771 }
 0x64f   : > { %v2866_v63 = vsub.f32 %v5013_v56, %v2828_v34  ;;  %4417 = vlog2.f32 %v2772_v33 }
 0x650   : > { %v4412_v4 = vpop.eup %4411 }
 0x651   : > { %2898 = vst [vmem:[#allocation12 + $0xc8] sm:$0xff] %v2866_v63  ;;  %v2830_v25 = vmul.f32 0.6931472, %v4412_v4 }
 0x652   : > { %v2774_v38 = vpop.xlane.xlu0 %2773 }
 0x653   : > { %v2867_v3 = vsub.f32 %v5017_v30, %v2830_v25  ;;  %4419 = vlog2.f32 %v2774_v38 }
 0x654   : > { %v4414_v39 = vpop.eup %4413 }
 0x655   : > { %2899 = vst [vmem:[#allocation12 + $0xd0] sm:$0xff] %v2867_v3  ;;  %v2832_v32 = vmul.f32 0.6931472, %v4414_v39 }
 0x656   : > { %v2776_v31 = vpop.xlane.xlu1 %2775 }
 0x657   : > { %v2868_v9 = vsub.f32 %v5021_v5, %v2832_v32  ;;  %4421 = vlog2.f32 %v2776_v31 }
 0x658   : > { %v4416_v46 = vpop.eup %4415 }
 0x659   : > { %2900 = vst [vmem:[#allocation12 + $0xd8] sm:$0xff] %v2868_v9  ;;  %v2834_v13 = vmul.f32 0.6931472, %v4416_v46 }
 0x65b   : > { %v2869_v56 = vsub.f32 %v5025_v12, %v2834_v13 }
 0x65c   : > { %v4418_v50 = vpop.eup %4417 }
 0x65d   : > { %2901 = vst [vmem:[#allocation12 + $0xe0] sm:$0xff] %v2869_v56  ;;  %v2836_v37 = vmul.f32 0.6931472, %v4418_v50 }
 0x65f   : > { %v2870_v2 = vsub.f32 %v5029_v48, %v2836_v37 }
 0x660   : > { %v4420_v53 = vpop.eup %4419 }
 0x661   : > { %2902 = vst [vmem:[#allocation12 + $0xe8] sm:$0xff] %v2870_v2  ;;  %v2838_v30 = vmul.f32 0.6931472, %v4420_v53 }
 0x663   : > { %v2871_v43 = vsub.f32 %v5033_v21, %v2838_v30 }
 0x664   : > { %v4422_v20 = vpop.eup %4421 }
 0x665   : > { %2903 = vst [vmem:[#allocation12 + $0xf0] sm:$0xff] %v2871_v43  ;;  %v2840_v55 = vmul.f32 0.6931472, %v4422_v20 }
 0x667   : > { %v2872_v5 = vsub.f32 %v5037_v1, %v2840_v55 }
 0x669   : > { %2904 = vst [vmem:[#allocation12 + $0xf8] sm:$0xff] %v2872_v5 }
 0x66a PF: > { %p5074_p5 = scmp.eq.s32.totalorder %s3000_s26, 1  ;;  %s4600_s12 = smov [#allocation12]  }
 0x66b   : > { %s2914_s16 = sshll.u32 %s4600_s12, 4  ;;  %s2915_s16 = int_to_ptr.vmem [resolvable:$true] %s2914_s16 }
 0x66c   : > { %s4527_s17 = scalar_lea.vmem %s2915_s16, 4096  ;;  %p4534_p9 = scmp.lt.s32.totalorder %s2915_s16, %s2915_s16 }
 0x66d   : > { %p4528_p7 = scmp.ne.s32.totalorder %s2915_s16, %s4527_s17  ;;  %p4535_p10 = scmp.lt.s32.totalorder %s4527_s17, %s4527_s17 }
 0x66f   : > { %p4529_p4 = pnand %p4528_p7, %p5074_p5  ;;  %p4536_p11 = por %p4535_p10, %p4534_p9 }
 0x671   : > { %p4530_p8 = pneg %p4529_p4 }
 0x673   : > { %p4537_p12 = pnand %p4536_p11, %p4530_p8 }
 0x675   : > { %4540 = shalt.err (!%p4537_p12)
}
 0x676   : > { %s4601_s18 = smov 128   ;;  %s4602_s26 = smov 8  }
 0x677   : > { %4057 = dma.vmem_to_hbm [thread:$0]  (%p5074_p5), %s2915_s16, 4096, %s5104_s6, [#allocation6], %s4601_s18, %s4601_s18, %s4602_s26  }
 0x678   : > { %4576 = dma.done.wait (%p5074_p5), [#allocation6], 4096  }
 0x679   : > { %4578 = vsyncadd (%p5074_p5), [#allocation6], 4294963200 }
 0x67a PF: > { %s20_s23 = sadd.s32 1, %s4589_s23   ;;  %s5110_s21 = smov %s4585_s22 }
 0x67b   : > { %p17_p6 = scmp.ge.s32.totalorder %s20_s23, 4   ;;  %s5111_s22 = smov %s5113_s30 }
 0x67d   :  { %19 = sbr.rel (!%p17_p6) target bundleno = 5 (0x5), region = 104 }
 0x682   :  { %2930 = vsyncpa [#allocation5], 1 }
 0x683   :  { %2932 = vsyncpa [#allocation5 + $0x1], 1 }
 0x684   :  { %2933 = vsyncpa [#allocation8], 1 }
 0x685   :  { %2934 = vsyncpa [#allocation11], 1 }
 0x686   :  { %2935 = vsyncpa [#allocation6], 1 }
 0x687   :  { %2937 = vsyncpa [#allocation6 + $0x1], 1 }

</bundles_post_ra>
